<compile_context>
chip_gen: v6e
topology: v6e:2x2x1
jax: 0.10.0
libtpu: 0.0.40
codegen_flags: <defaults>
</compile_context>

<pallas_src>
import numpy as np
import jax
import jax.numpy as jnp
from jax.experimental import pallas as pl
from jax.experimental.pallas import tpu as pltpu


# ----- fixed dims implied by the torch module -----
_H, _W = 7, 7
_P = _H * _W              # 49 board cells
_C1, _C2 = 4, 6           # conv channels
_T = 11                   # explanation length
_E = 32                   # exp_embed
_NF = _C2 * _P            # 294 conv features per board
_FC_IN = 2 * _NF + 2      # 590


# ----------------------------------------------------------------------------
# Init-time lowering helpers (host side, numpy)
# ----------------------------------------------------------------------------

def _conv3x3_same_dense(w, b, H=_H, W=_W):
    """3x3 'same' conv -> dense (Cin*H*W, Cout*H*W) matmul, NCHW-flat both sides."""
    w = np.asarray(w, np.float32)
    b = np.asarray(b, np.float32)
    Cout, Cin, KH, KW = w.shape
    mat = np.zeros((Cin * H * W, Cout * H * W), np.float32)
    for co in range(Cout):
        for ci in range(Cin):
            for ky in range(KH):
                for kx in range(KW):
                    val = w[co, ci, ky, kx]
                    for oy in range(H):
                        iy = oy + ky - 1
                        if not (0 <= iy < H):
                            continue
                        for ox in range(W):
                            ix = ox + kx - 1
                            if not (0 <= ix < W):
                                continue
                            mat[ci * H * W + iy * W + ix,
                                co * H * W + oy * W + ox] += val
    bias = np.repeat(b, H * W).reshape(1, Cout * H * W)
    return mat, bias


def _pack_rows(entries, width, row_align):
    """Pack 2-D arrays along rows into one (R, width) buffer.

    Returns (np buffer, layout dict name -> (row_start, n_rows, n_cols)).
    Section starts are aligned to `row_align` rows so in-kernel ref slices are
    sublane-tile aligned (16 for bf16 buffers, 1 for the tiny f32 bias slab).
    """
    layout, row = {}, 0
    for name, a in entries:
        a = np.asarray(a, np.float32)
        r, c = a.shape
        assert c <= width, (name, c, width)
        row = ((row + row_align - 1) // row_align) * row_align
        layout[name] = (row, r, c)
        row += r
    total = ((row + row_align - 1) // row_align) * row_align
    buf = np.zeros((total, width), np.float32)
    for name, a in entries:
        s, r, c = layout[name]
        buf[s:s + r, :c] = np.asarray(a, np.float32)
    return buf, layout


def init_params(key, vocab_size, input_state_embed=64, hidden_state_embed=32,
                output_state_embed=16, exp_embed=32, output_exp_embed=16):
    ks = jax.random.split(key, 16)

    def uni(k, shape, fan_in):
        bound = float(fan_in) ** -0.5
        return np.asarray(jax.random.uniform(k, shape, jnp.float32, -bound, bound))

    conv1_w = uni(ks[0], (_C1, 1, 3, 3), 9)
    conv1_b = uni(ks[1], (_C1,), 9)
    conv2_w = uni(ks[2], (_C2, _C1, 3, 3), _C1 * 9)
    conv2_b = uni(ks[3], (_C2,), _C1 * 9)
    fcl1_w = uni(ks[4], (input_state_embed, _FC_IN), _FC_IN)       # torch (out, in)
    fcl1_b = uni(ks[5], (input_state_embed,), _FC_IN)
    hid_w = uni(ks[6], (hidden_state_embed, input_state_embed), input_state_embed)
    hid_b = uni(ks[7], (hidden_state_embed,), input_state_embed)
    out_w = uni(ks[8], (output_state_embed, hidden_state_embed), hidden_state_embed)
    out_b = uni(ks[9], (output_state_embed,), hidden_state_embed)
    emb = np.array(jax.random.normal(ks[10], (vocab_size, exp_embed), jnp.float32))
    emb[0, :] = 0.0                                                # padding_idx=0
    Hh = output_exp_embed
    w_ih = uni(ks[11], (4 * Hh, exp_embed), Hh)                    # gate order i,f,g,o
    w_hh = uni(ks[12], (4 * Hh, Hh), Hh)
    b_ih = uni(ks[13], (4 * Hh,), Hh)
    b_hh = uni(ks[14], (4 * Hh,), Hh)

    conv1_wd, conv1_bd = _conv3x3_same_dense(conv1_w, conv1_b)     # (49,196),(1,196)
    conv2_wd, conv2_bd = _conv3x3_same_dense(conv2_w, conv2_b)     # (196,294),(1,294)
    fcl1_wm = fcl1_w.T                                             # (590, 64)
    # Fold the embedding table into the LSTM input projection:
    # x_t @ W_ih^T == onehot(token) @ (emb @ W_ih^T). Row 0 of emb is zero, so the
    # padding token still contributes only the bias.
    emb_wx = emb @ w_ih.T                                          # (V, 4H)

    narrow_width = max(input_state_embed, 4 * Hh)                  # 64

    wide_np, wide_l = _pack_rows(
        [("conv1_w", conv1_wd), ("conv2_w", conv2_wd)],
        width=_NF, row_align=16)
    narrow_np, narrow_l = _pack_rows(
        [("fc1_wa", fcl1_wm[:_NF]),               # FCL_1 rows for prev-board features
         ("fc1_wb", fcl1_wm[_NF:2 * _NF]),        # FCL_1 rows for curr-board features
         ("lstm_wh", w_hh.T),                     # (H, 4H) cols [i|f|g|o]
         ("hid_w", hid_w.T), ("out_w", out_w.T),
         ("emb_wx", emb_wx)],
        width=narrow_width, row_align=16)
    bias_np, bias_l = _pack_rows(
        [("conv1_b", conv1_bd), ("conv2_b", conv2_bd),
         ("fc1_b", fcl1_b.reshape(1, -1)),
         ("fc1_wgo", fcl1_wm[2 * _NF:2 * _NF + 1]),   # gameOver column of FCL_1
         ("fc1_wp", fcl1_wm[2 * _NF + 1:2 * _NF + 2]),  # player column of FCL_1
         ("hid_b", hid_b.reshape(1, -1)), ("out_b", out_b.reshape(1, -1)),
         ("lstm_b", (b_ih + b_hh).reshape(1, -1))],
        width=_NF, row_align=1)

    params = dict(
        w_wide=jnp.asarray(wide_np, jnp.bfloat16),     # (272, 294) conv dense mats
        w_narrow=jnp.asarray(narrow_np, jnp.bfloat16),  # (784, 64) everything 64-wide
        fbias=jnp.asarray(bias_np, jnp.float32),        # (8, 294) biases + go/p cols
    )
    layout = dict(wide=wide_l, narrow=narrow_l, fbias=bias_l, vocab=vocab_size,
                  n_state_out=output_state_embed, hl=output_exp_embed)
    return params, layout


# ----------------------------------------------------------------------------
# Fused Pallas kernel
# ----------------------------------------------------------------------------

def _build_kernel(layout, BP):
    wide_l, nar_l, bias_l = layout["wide"], layout["narrow"], layout["fbias"]
    V = layout["vocab"]
    HL = layout["hl"]            # 16 (LSTM hidden)
    NSO = layout["n_state_out"]  # 16 (state head output)

    def sl(ref, l, name):        # static, tile-aligned section slice (zero-cost view)
        s, r, c = l[name]
        return ref[s:s + r, 0:c]

    def kernel(w_wide_ref, w_narrow_ref, fb_ref, acts_ref, tok_ref, out_ref):
        f32, bf16 = jnp.float32, jnp.bfloat16

        # -------- state head: both boards row-stacked, convs as dense MXU matmuls
        boards = acts_ref[:, 0:_P].astype(bf16)                      # (2*BP, 49)
        h = jnp.dot(boards, sl(w_wide_ref, wide_l, "conv1_w"),
                    preferred_element_type=f32) + sl(fb_ref, bias_l, "conv1_b")
        h = jnp.maximum(h, 0.0).astype(bf16)                         # (2*BP, 196)
        feat = jnp.dot(h, sl(w_wide_ref, wide_l, "conv2_w"),
                       preferred_element_type=f32) + sl(fb_ref, bias_l, "conv2_b")
        feat = jnp.maximum(feat, 0.0)                                # (2*BP, 294) f32

        x_go = acts_ref[0:BP, _P:_P + 1]                             # (BP, 1) f32
        x_p = acts_ref[0:BP, _P + 1:_P + 2]
        # FCL_1: weight rows 0:294 -> prev-board feats, 294:588 -> curr-board feats,
        # 588 -> gameOver, 589 -> player (matches torch stack/cat order).
        pre1 = (jnp.dot(feat[0:BP].astype(bf16), sl(w_narrow_ref, nar_l, "fc1_wa"),
                        preferred_element_type=f32)
                + jnp.dot(feat[BP:2 * BP].astype(bf16),
                          sl(w_narrow_ref, nar_l, "fc1_wb"),
                          preferred_element_type=f32)
                + x_go * sl(fb_ref, bias_l, "fc1_wgo")
                + x_p * sl(fb_ref, bias_l, "fc1_wp")
                + sl(fb_ref, bias_l, "fc1_b"))
        h1 = jnp.maximum(pre1, 0.0).astype(bf16)                     # (BP, 64)
        h2 = jnp.maximum(
            jnp.dot(h1, sl(w_narrow_ref, nar_l, "hid_w"),
                    preferred_element_type=f32) + sl(fb_ref, bias_l, "hid_b"), 0.0)
        state = (jnp.dot(h2.astype(bf16), sl(w_narrow_ref, nar_l, "out_w"),
                         preferred_element_type=f32)
                 + sl(fb_ref, bias_l, "out_b"))                      # (BP, NSO)

        # -------- explanation head: fused embed+input-projection, then LSTM -------
        TBP = _T * BP
        onehot = (tok_ref[...] ==
                  jax.lax.broadcasted_iota(jnp.int32, (TBP, V), 1))
        onehot = onehot.astype(f32).astype(bf16)                     # exact 0/1
        # Hoisted x-projection for all timesteps in one matmul (table folded in).
        xproj = (jnp.dot(onehot, sl(w_narrow_ref, nar_l, "emb_wx"),
                         preferred_element_type=f32)
                 + sl(fb_ref, bias_l, "lstm_b"))                     # (T*BP, 4H) f32

        lstm_wh = sl(w_narrow_ref, nar_l, "lstm_wh")                 # (HL, 4H) bf16
        h_t = jnp.zeros((BP, HL), f32)
        c_t = jnp.zeros((BP, HL), f32)
        for t in range(_T):  # static unroll; only h@Wh + EUP on the serial path
            gates = xproj[t * BP:(t + 1) * BP] + jnp.dot(            # aligned 8-row tile
                h_t.astype(bf16), lstm_wh, preferred_element_type=f32)
            sig = jax.nn.sigmoid(gates)   # one EUP pass covers i|f|o gates
            tng = jnp.tanh(gates)         # one EUP pass covers g gate
            c_t = sig[:, HL:2 * HL] * c_t + sig[:, 0:HL] * tng[:, 2 * HL:3 * HL]
            h_t = sig[:, 3 * HL:4 * HL] * jnp.tanh(c_t)
        expl = jnp.maximum(h_t, 0.0)                                 # (BP, HL)

        # single merged output (one writeback DMA); wrapper splits it
        out_ref[:, 0:NSO] = state
        out_ref[:, NSO:NSO + HL] = expl

    return kernel


# ----------------------------------------------------------------------------
# Wrapper
# ----------------------------------------------------------------------------

def masked_select_reshape(x, mask, k):
    # TODO(synk): torch.masked_select has a data-dependent output shape; here each
    # mask row is assumed to keep exactly k elements (demo: all-True), so it reduces
    # to an elementwise mask + reshape (scattered True elements are NOT compacted).
    return (x * mask.astype(x.dtype)).reshape(x.shape[0], k)


def make_forward(layout):
    NSO = layout["n_state_out"]
    HL = layout["hl"]

    def forward(params, x_prevBoard, x_currBoard, x_gameOver, x_player,
                x_explanation, mask_prevB, mask_currB, mask_gameOver,
                mask_player, mask_explanation):
        B = x_prevBoard.shape[0]
        BP = ((B + 7) // 8) * 8   # pad batch to a sublane tile -> all in-kernel row
                                  # slices (feat halves, xproj[t], h/c) are aligned

        x_e = masked_select_reshape(x_explanation, mask_explanation, _T).astype(jnp.int32)
        x_pb = masked_select_reshape(x_prevBoard, mask_prevB, _P).astype(jnp.float32)
        x_cb = masked_select_reshape(x_currBoard, mask_currB, _P).astype(jnp.float32)
        x_go = masked_select_reshape(x_gameOver, mask_gameOver, 1).astype(jnp.float32)
        x_p = masked_select_reshape(x_player, mask_player, 1).astype(jnp.float32)

        # Packed float activations: rows [0,BP) = prev board (+ gameOver/player lanes),
        # rows [BP,2BP) = curr board; padding rows are zero (harmless, sliced away).
        acts = jnp.zeros((2 * BP, _P + 2), jnp.float32)
        acts = acts.at[:B, 0:_P].set(x_pb)
        acts = acts.at[:B, _P].set(x_go[:, 0])
        acts = acts.at[:B, _P + 1].set(x_p[:, 0])
        acts = acts.at[BP:BP + B, 0:_P].set(x_cb)

        # Time-major token indices, one 8-row tile per timestep (row = t*BP + b);
        # padding rows hold token 0 -> zero embedding row -> only bias, never read.
        tok = jnp.zeros((_T, BP), jnp.int32).at[:, :B].set(x_e.T).reshape(_T * BP, 1)

        kernel = _build_kernel(layout, BP)
        vmem = pl.BlockSpec(memory_space=pltpu.MemorySpace.VMEM)
        # Grid-less single invocation: weights + activations < 0.5 MiB, fully
        # VMEM-resident, 5 input DMAs + 1 output DMA.
        # TODO(synk): for large production batches on v7x, add a batch grid axis with
        # dimension_semantics=("parallel",) so both TensorCores split the work.
        out = pl.pallas_call(
            kernel,
            out_shape=jax.ShapeDtypeStruct((BP, NSO + HL), jnp.float32),
            in_specs=[vmem] * 5,
            out_specs=vmem,
        )(params["w_wide"], params["w_narrow"], params["fbias"], acts, tok)

        state_final = out[:B, 0:NSO]
        explanation_final = out[:B, NSO:NSO + HL]
        return state_final, explanation_final

    return forward


if __name__ == "__main__":
    B = 2
    vocab_size = 50
    key = jax.random.PRNGKey(0)
    kp, k1, k2, k3, k4, k5 = jax.random.split(key, 6)

    params, layout = init_params(kp, vocab_size)
    forward = jax.jit(make_forward(layout))

    x_prevBoard = jax.random.randint(k1, (B, 49), 0, 3).astype(jnp.float32)
    x_currBoard = jax.random.randint(k2, (B, 49), 0, 3).astype(jnp.float32)
    x_gameOver = jax.random.randint(k3, (B, 1), 0, 2).astype(jnp.float32)
    x_player = jax.random.randint(k4, (B, 1), 1, 3).astype(jnp.float32)
    x_explanation = jax.random.randint(k5, (B, 11), 1, vocab_size).astype(jnp.int32)

    mask_prevB = jnp.ones_like(x_prevBoard, dtype=jnp.bool_)
    mask_currB = jnp.ones_like(x_currBoard, dtype=jnp.bool_)
    mask_gameOver = jnp.ones_like(x_gameOver, dtype=jnp.bool_)
    mask_player = jnp.ones_like(x_player, dtype=jnp.bool_)
    mask_explanation = jnp.ones_like(x_explanation, dtype=jnp.bool_)

    state_final, explanation_final = forward(
        params, x_prevBoard, x_currBoard, x_gameOver, x_player, x_explanation,
        mask_prevB, mask_currB, mask_gameOver, mask_player, mask_explanation)
    jax.block_until_ready((state_final, explanation_final))

    assert state_final.shape == (B, 16) and explanation_final.shape == (B, 16)
    assert bool(jnp.all(jnp.isfinite(state_final))) and bool(jnp.all(jnp.isfinite(explanation_final)))
    print("KERNEL_OK")
</pallas_src>

<mosaic_0001>
module attributes {stable_mosaic.version = 11 : i64} {
  func.func @kernel(%arg0: memref<272x294xbf16, #tpu.memory_space<vmem>>, %arg1: memref<784x64xbf16, #tpu.memory_space<vmem>>, %arg2: memref<8x294xf32, #tpu.memory_space<vmem>>, %arg3: memref<16x51xf32, #tpu.memory_space<vmem>>, %arg4: memref<88x1xi32, #tpu.memory_space<vmem>>, %arg5: memref<8x32xf32, #tpu.memory_space<vmem>>) attributes {dimension_semantics = [], scalar_prefetch = 0 : i64, scratch_operands = 0 : i64, tpu.core_type = #tpu.core_type<tc>} {
    %c0 = arith.constant 0 : index
    %c0_0 = arith.constant 0 : index
    %0 = vector.load %arg3[%c0, %c0_0] : memref<16x51xf32, #tpu.memory_space<vmem>>, vector<16x49xf32>
    %1 = arith.truncf %0 : vector<16x49xf32> to vector<16x49xbf16>
    %c0_1 = arith.constant 0 : index
    %c0_2 = arith.constant 0 : index
    %2 = vector.load %arg0[%c0_1, %c0_2] : memref<272x294xbf16, #tpu.memory_space<vmem>>, vector<49x196xbf16>
    %cst = arith.constant dense<0.000000e+00> : vector<16x196xf32>
    %3 = tpu.matmul %1, %2, %cst {dimension_numbers = #tpu.dot_dimension_numbers<[1], [0], [0], [1], [0, 0, 1, 1], [], []>} : vector<16x49xbf16>, vector<49x196xbf16>, vector<16x196xf32> -> vector<16x196xf32>
    %c0_3 = arith.constant 0 : index
    %c0_4 = arith.constant 0 : index
    %4 = vector.load %arg2[%c0_3, %c0_4] : memref<8x294xf32, #tpu.memory_space<vmem>>, vector<1x196xf32>
    %5 = vector.broadcast %4 : vector<1x196xf32> to vector<16x196xf32>
    %6 = arith.addf %3, %5 : vector<16x196xf32>
    %cst_5 = arith.constant 0.000000e+00 : f32
    %7 = vector.broadcast %cst_5 : f32 to vector<16x196xf32>
    %8 = arith.maximumf %6, %7 : vector<16x196xf32>
    %9 = arith.truncf %8 : vector<16x196xf32> to vector<16x196xbf16>
    %c64 = arith.constant 64 : index
    %c0_6 = arith.constant 0 : index
    %10 = vector.load %arg0[%c64, %c0_6] : memref<272x294xbf16, #tpu.memory_space<vmem>>, vector<196x294xbf16>
    %cst_7 = arith.constant dense<0.000000e+00> : vector<16x294xf32>
    %11 = tpu.matmul %9, %10, %cst_7 {dimension_numbers = #tpu.dot_dimension_numbers<[1], [0], [0], [1], [0, 0, 1, 1], [], []>} : vector<16x196xbf16>, vector<196x294xbf16>, vector<16x294xf32> -> vector<16x294xf32>
    %c1 = arith.constant 1 : index
    %c0_8 = arith.constant 0 : index
    %12 = vector.load %arg2[%c1, %c0_8] : memref<8x294xf32, #tpu.memory_space<vmem>>, vector<1x294xf32>
    %13 = vector.broadcast %12 : vector<1x294xf32> to vector<16x294xf32>
    %14 = arith.addf %11, %13 : vector<16x294xf32>
    %cst_9 = arith.constant 0.000000e+00 : f32
    %15 = vector.broadcast %cst_9 : f32 to vector<16x294xf32>
    %16 = arith.maximumf %14, %15 : vector<16x294xf32>
    %c0_10 = arith.constant 0 : index
    %c49 = arith.constant 49 : index
    %17 = vector.load %arg3[%c0_10, %c49] : memref<16x51xf32, #tpu.memory_space<vmem>>, vector<8x1xf32>
    %c0_11 = arith.constant 0 : index
    %c50 = arith.constant 50 : index
    %18 = vector.load %arg3[%c0_11, %c50] : memref<16x51xf32, #tpu.memory_space<vmem>>, vector<8x1xf32>
    %19 = vector.extract_strided_slice %16 {offsets = [0, 0], sizes = [8, 294], strides = [1, 1]} : vector<16x294xf32> to vector<8x294xf32>
    %20 = arith.truncf %19 : vector<8x294xf32> to vector<8x294xbf16>
    %c0_12 = arith.constant 0 : index
    %c0_13 = arith.constant 0 : index
    %21 = vector.load %arg1[%c0_12, %c0_13] : memref<784x64xbf16, #tpu.memory_space<vmem>>, vector<294x64xbf16>
    %cst_14 = arith.constant dense<0.000000e+00> : vector<8x64xf32>
    %22 = tpu.matmul %20, %21, %cst_14 {dimension_numbers = #tpu.dot_dimension_numbers<[1], [0], [0], [1], [0, 0, 1, 1], [], []>} : vector<8x294xbf16>, vector<294x64xbf16>, vector<8x64xf32> -> vector<8x64xf32>
    %23 = vector.extract_strided_slice %16 {offsets = [8, 0], sizes = [8, 294], strides = [1, 1]} : vector<16x294xf32> to vector<8x294xf32>
    %24 = arith.truncf %23 : vector<8x294xf32> to vector<8x294xbf16>
    %c304 = arith.constant 304 : index
    %c0_15 = arith.constant 0 : index
    %25 = vector.load %arg1[%c304, %c0_15] : memref<784x64xbf16, #tpu.memory_space<vmem>>, vector<294x64xbf16>
    %cst_16 = arith.constant dense<0.000000e+00> : vector<8x64xf32>
    %26 = tpu.matmul %24, %25, %cst_16 {dimension_numbers = #tpu.dot_dimension_numbers<[1], [0], [0], [1], [0, 0, 1, 1], [], []>} : vector<8x294xbf16>, vector<294x64xbf16>, vector<8x64xf32> -> vector<8x64xf32>
    %27 = arith.addf %22, %26 : vector<8x64xf32>
    %c3 = arith.constant 3 : index
    %c0_17 = arith.constant 0 : index
    %28 = vector.load %arg2[%c3, %c0_17] : memref<8x294xf32, #tpu.memory_space<vmem>>, vector<1x64xf32>
    %29 = vector.broadcast %17 : vector<8x1xf32> to vector<8x64xf32>
    %30 = vector.broadcast %28 : vector<1x64xf32> to vector<8x64xf32>
    %31 = arith.mulf %29, %30 : vector<8x64xf32>
    %32 = arith.addf %27, %31 : vector<8x64xf32>
    %c4 = arith.constant 4 : index
    %c0_18 = arith.constant 0 : index
    %33 = vector.load %arg2[%c4, %c0_18] : memref<8x294xf32, #tpu.memory_space<vmem>>, vector<1x64xf32>
    %34 = vector.broadcast %18 : vector<8x1xf32> to vector<8x64xf32>
    %35 = vector.broadcast %33 : vector<1x64xf32> to vector<8x64xf32>
    %36 = arith.mulf %34, %35 : vector<8x64xf32>
    %37 = arith.addf %32, %36 : vector<8x64xf32>
    %c2 = arith.constant 2 : index
    %c0_19 = arith.constant 0 : index
    %38 = vector.load %arg2[%c2, %c0_19] : memref<8x294xf32, #tpu.memory_space<vmem>>, vector<1x64xf32>
    %39 = vector.broadcast %38 : vector<1x64xf32> to vector<8x64xf32>
    %40 = arith.addf %37, %39 : vector<8x64xf32>
    %cst_20 = arith.constant 0.000000e+00 : f32
    %41 = vector.broadcast %cst_20 : f32 to vector<8x64xf32>
    %42 = arith.maximumf %40, %41 : vector<8x64xf32>
    %43 = arith.truncf %42 : vector<8x64xf32> to vector<8x64xbf16>
    %c624 = arith.constant 624 : index
    %c0_21 = arith.constant 0 : index
    %44 = vector.load %arg1[%c624, %c0_21] : memref<784x64xbf16, #tpu.memory_space<vmem>>, vector<64x32xbf16>
    %cst_22 = arith.constant dense<0.000000e+00> : vector<8x32xf32>
    %45 = tpu.matmul %43, %44, %cst_22 {dimension_numbers = #tpu.dot_dimension_numbers<[1], [0], [0], [1], [0, 0, 1, 1], [], []>} : vector<8x64xbf16>, vector<64x32xbf16>, vector<8x32xf32> -> vector<8x32xf32>
    %c5 = arith.constant 5 : index
    %c0_23 = arith.constant 0 : index
    %46 = vector.load %arg2[%c5, %c0_23] : memref<8x294xf32, #tpu.memory_space<vmem>>, vector<1x32xf32>
    %47 = vector.broadcast %46 : vector<1x32xf32> to vector<8x32xf32>
    %48 = arith.addf %45, %47 : vector<8x32xf32>
    %cst_24 = arith.constant 0.000000e+00 : f32
    %49 = vector.broadcast %cst_24 : f32 to vector<8x32xf32>
    %50 = arith.maximumf %48, %49 : vector<8x32xf32>
    %51 = arith.truncf %50 : vector<8x32xf32> to vector<8x32xbf16>
    %c688 = arith.constant 688 : index
    %c0_25 = arith.constant 0 : index
    %52 = vector.load %arg1[%c688, %c0_25] : memref<784x64xbf16, #tpu.memory_space<vmem>>, vector<32x16xbf16>
    %cst_26 = arith.constant dense<0.000000e+00> : vector<8x16xf32>
    %53 = tpu.matmul %51, %52, %cst_26 {dimension_numbers = #tpu.dot_dimension_numbers<[1], [0], [0], [1], [0, 0, 1, 1], [], []>} : vector<8x32xbf16>, vector<32x16xbf16>, vector<8x16xf32> -> vector<8x16xf32>
    %c6 = arith.constant 6 : index
    %c0_27 = arith.constant 0 : index
    %54 = vector.load %arg2[%c6, %c0_27] : memref<8x294xf32, #tpu.memory_space<vmem>>, vector<1x16xf32>
    %55 = vector.broadcast %54 : vector<1x16xf32> to vector<8x16xf32>
    %56 = arith.addf %53, %55 : vector<8x16xf32>
    %c0_28 = arith.constant 0 : index
    %c0_29 = arith.constant 0 : index
    %57 = vector.load %arg4[%c0_28, %c0_29] : memref<88x1xi32, #tpu.memory_space<vmem>>, vector<88x1xi32>
    %58 = tpu.iota {dimensions = array<i32: 1>} : vector<88x50xi32>
    %59 = vector.broadcast %57 : vector<88x1xi32> to vector<88x50xi32>
    %60 = arith.cmpi eq, %59, %58 : vector<88x50xi32>
    %61 = arith.extui %60 : vector<88x50xi1> to vector<88x50xi32>
    %62 = arith.sitofp %61 : vector<88x50xi32> to vector<88x50xf32>
    %63 = arith.truncf %62 : vector<88x50xf32> to vector<88x50xbf16>
    %c720 = arith.constant 720 : index
    %c0_30 = arith.constant 0 : index
    %64 = vector.load %arg1[%c720, %c0_30] : memref<784x64xbf16, #tpu.memory_space<vmem>>, vector<50x64xbf16>
    %cst_31 = arith.constant dense<0.000000e+00> : vector<88x64xf32>
    %65 = tpu.matmul %63, %64, %cst_31 {dimension_numbers = #tpu.dot_dimension_numbers<[1], [0], [0], [1], [0, 0, 1, 1], [], []>} : vector<88x50xbf16>, vector<50x64xbf16>, vector<88x64xf32> -> vector<88x64xf32>
    %c7 = arith.constant 7 : index
    %c0_32 = arith.constant 0 : index
    %66 = vector.load %arg2[%c7, %c0_32] : memref<8x294xf32, #tpu.memory_space<vmem>>, vector<1x64xf32>
    %67 = vector.broadcast %66 : vector<1x64xf32> to vector<88x64xf32>
    %68 = arith.addf %65, %67 : vector<88x64xf32>
    %c608 = arith.constant 608 : index
    %c0_33 = arith.constant 0 : index
    %69 = vector.load %arg1[%c608, %c0_33] : memref<784x64xbf16, #tpu.memory_space<vmem>>, vector<16x64xbf16>
    %cst_34 = arith.constant 0.000000e+00 : f32
    %70 = vector.broadcast %cst_34 : f32 to vector<8x16xf32>
    %cst_35 = arith.constant 0.000000e+00 : f32
    %71 = vector.broadcast %cst_35 : f32 to vector<8x16xf32>
    %72 = vector.extract_strided_slice %68 {offsets = [0, 0], sizes = [8, 64], strides = [1, 1]} : vector<88x64xf32> to vector<8x64xf32>
    %73 = arith.truncf %70 : vector<8x16xf32> to vector<8x16xbf16>
    %cst_36 = arith.constant dense<0.000000e+00> : vector<8x64xf32>
    %74 = tpu.matmul %73, %69, %cst_36 {dimension_numbers = #tpu.dot_dimension_numbers<[1], [0], [0], [1], [0, 0, 1, 1], [], []>} : vector<8x16xbf16>, vector<16x64xbf16>, vector<8x64xf32> -> vector<8x64xf32>
    %75 = arith.addf %72, %74 : vector<8x64xf32>
    %76 = arith.negf %75 : vector<8x64xf32>
    %77 = math.exp %76 : vector<8x64xf32>
    %cst_37 = arith.constant 1.000000e+00 : f32
    %78 = vector.broadcast %cst_37 : f32 to vector<8x64xf32>
    %79 = arith.addf %78, %77 : vector<8x64xf32>
    %80 = arith.divf %78, %79 : vector<8x64xf32>
    %81 = math.tanh %75 : vector<8x64xf32>
    %82 = vector.extract_strided_slice %80 {offsets = [0, 16], sizes = [8, 16], strides = [1, 1]} : vector<8x64xf32> to vector<8x16xf32>
    %83 = arith.mulf %82, %71 : vector<8x16xf32>
    %84 = vector.extract_strided_slice %80 {offsets = [0, 0], sizes = [8, 16], strides = [1, 1]} : vector<8x64xf32> to vector<8x16xf32>
    %85 = vector.extract_strided_slice %81 {offsets = [0, 32], sizes = [8, 16], strides = [1, 1]} : vector<8x64xf32> to vector<8x16xf32>
    %86 = arith.mulf %84, %85 : vector<8x16xf32>
    %87 = arith.addf %83, %86 : vector<8x16xf32>
    %88 = vector.extract_strided_slice %80 {offsets = [0, 48], sizes = [8, 16], strides = [1, 1]} : vector<8x64xf32> to vector<8x16xf32>
    %89 = math.tanh %87 : vector<8x16xf32>
    %90 = arith.mulf %88, %89 : vector<8x16xf32>
    %91 = vector.extract_strided_slice %68 {offsets = [8, 0], sizes = [8, 64], strides = [1, 1]} : vector<88x64xf32> to vector<8x64xf32>
    %92 = arith.truncf %90 : vector<8x16xf32> to vector<8x16xbf16>
    %cst_38 = arith.constant dense<0.000000e+00> : vector<8x64xf32>
    %93 = tpu.matmul %92, %69, %cst_38 {dimension_numbers = #tpu.dot_dimension_numbers<[1], [0], [0], [1], [0, 0, 1, 1], [], []>} : vector<8x16xbf16>, vector<16x64xbf16>, vector<8x64xf32> -> vector<8x64xf32>
    %94 = arith.addf %91, %93 : vector<8x64xf32>
    %95 = arith.negf %94 : vector<8x64xf32>
    %96 = math.exp %95 : vector<8x64xf32>
    %cst_39 = arith.constant 1.000000e+00 : f32
    %97 = vector.broadcast %cst_39 : f32 to vector<8x64xf32>
    %98 = arith.addf %97, %96 : vector<8x64xf32>
    %99 = arith.divf %97, %98 : vector<8x64xf32>
    %100 = math.tanh %94 : vector<8x64xf32>
    %101 = vector.extract_strided_slice %99 {offsets = [0, 16], sizes = [8, 16], strides = [1, 1]} : vector<8x64xf32> to vector<8x16xf32>
    %102 = arith.mulf %101, %87 : vector<8x16xf32>
    %103 = vector.extract_strided_slice %99 {offsets = [0, 0], sizes = [8, 16], strides = [1, 1]} : vector<8x64xf32> to vector<8x16xf32>
    %104 = vector.extract_strided_slice %100 {offsets = [0, 32], sizes = [8, 16], strides = [1, 1]} : vector<8x64xf32> to vector<8x16xf32>
    %105 = arith.mulf %103, %104 : vector<8x16xf32>
    %106 = arith.addf %102, %105 : vector<8x16xf32>
    %107 = vector.extract_strided_slice %99 {offsets = [0, 48], sizes = [8, 16], strides = [1, 1]} : vector<8x64xf32> to vector<8x16xf32>
    %108 = math.tanh %106 : vector<8x16xf32>
    %109 = arith.mulf %107, %108 : vector<8x16xf32>
    %110 = vector.extract_strided_slice %68 {offsets = [16, 0], sizes = [8, 64], strides = [1, 1]} : vector<88x64xf32> to vector<8x64xf32>
    %111 = arith.truncf %109 : vector<8x16xf32> to vector<8x16xbf16>
    %cst_40 = arith.constant dense<0.000000e+00> : vector<8x64xf32>
    %112 = tpu.matmul %111, %69, %cst_40 {dimension_numbers = #tpu.dot_dimension_numbers<[1], [0], [0], [1], [0, 0, 1, 1], [], []>} : vector<8x16xbf16>, vector<16x64xbf16>, vector<8x64xf32> -> vector<8x64xf32>
    %113 = arith.addf %110, %112 : vector<8x64xf32>
    %114 = arith.negf %113 : vector<8x64xf32>
    %115 = math.exp %114 : vector<8x64xf32>
    %cst_41 = arith.constant 1.000000e+00 : f32
    %116 = vector.broadcast %cst_41 : f32 to vector<8x64xf32>
    %117 = arith.addf %116, %115 : vector<8x64xf32>
    %118 = arith.divf %116, %117 : vector<8x64xf32>
    %119 = math.tanh %113 : vector<8x64xf32>
    %120 = vector.extract_strided_slice %118 {offsets = [0, 16], sizes = [8, 16], strides = [1, 1]} : vector<8x64xf32> to vector<8x16xf32>
    %121 = arith.mulf %120, %106 : vector<8x16xf32>
    %122 = vector.extract_strided_slice %118 {offsets = [0, 0], sizes = [8, 16], strides = [1, 1]} : vector<8x64xf32> to vector<8x16xf32>
    %123 = vector.extract_strided_slice %119 {offsets = [0, 32], sizes = [8, 16], strides = [1, 1]} : vector<8x64xf32> to vector<8x16xf32>
    %124 = arith.mulf %122, %123 : vector<8x16xf32>
    %125 = arith.addf %121, %124 : vector<8x16xf32>
    %126 = vector.extract_strided_slice %118 {offsets = [0, 48], sizes = [8, 16], strides = [1, 1]} : vector<8x64xf32> to vector<8x16xf32>
    %127 = math.tanh %125 : vector<8x16xf32>
    %128 = arith.mulf %126, %127 : vector<8x16xf32>
    %129 = vector.extract_strided_slice %68 {offsets = [24, 0], sizes = [8, 64], strides = [1, 1]} : vector<88x64xf32> to vector<8x64xf32>
    %130 = arith.truncf %128 : vector<8x16xf32> to vector<8x16xbf16>
    %cst_42 = arith.constant dense<0.000000e+00> : vector<8x64xf32>
    %131 = tpu.matmul %130, %69, %cst_42 {dimension_numbers = #tpu.dot_dimension_numbers<[1], [0], [0], [1], [0, 0, 1, 1], [], []>} : vector<8x16xbf16>, vector<16x64xbf16>, vector<8x64xf32> -> vector<8x64xf32>
    %132 = arith.addf %129, %131 : vector<8x64xf32>
    %133 = arith.negf %132 : vector<8x64xf32>
    %134 = math.exp %133 : vector<8x64xf32>
    %cst_43 = arith.constant 1.000000e+00 : f32
    %135 = vector.broadcast %cst_43 : f32 to vector<8x64xf32>
    %136 = arith.addf %135, %134 : vector<8x64xf32>
    %137 = arith.divf %135, %136 : vector<8x64xf32>
    %138 = math.tanh %132 : vector<8x64xf32>
    %139 = vector.extract_strided_slice %137 {offsets = [0, 16], sizes = [8, 16], strides = [1, 1]} : vector<8x64xf32> to vector<8x16xf32>
    %140 = arith.mulf %139, %125 : vector<8x16xf32>
    %141 = vector.extract_strided_slice %137 {offsets = [0, 0], sizes = [8, 16], strides = [1, 1]} : vector<8x64xf32> to vector<8x16xf32>
    %142 = vector.extract_strided_slice %138 {offsets = [0, 32], sizes = [8, 16], strides = [1, 1]} : vector<8x64xf32> to vector<8x16xf32>
    %143 = arith.mulf %141, %142 : vector<8x16xf32>
    %144 = arith.addf %140, %143 : vector<8x16xf32>
    %145 = vector.extract_strided_slice %137 {offsets = [0, 48], sizes = [8, 16], strides = [1, 1]} : vector<8x64xf32> to vector<8x16xf32>
    %146 = math.tanh %144 : vector<8x16xf32>
    %147 = arith.mulf %145, %146 : vector<8x16xf32>
    %148 = vector.extract_strided_slice %68 {offsets = [32, 0], sizes = [8, 64], strides = [1, 1]} : vector<88x64xf32> to vector<8x64xf32>
    %149 = arith.truncf %147 : vector<8x16xf32> to vector<8x16xbf16>
    %cst_44 = arith.constant dense<0.000000e+00> : vector<8x64xf32>
    %150 = tpu.matmul %149, %69, %cst_44 {dimension_numbers = #tpu.dot_dimension_numbers<[1], [0], [0], [1], [0, 0, 1, 1], [], []>} : vector<8x16xbf16>, vector<16x64xbf16>, vector<8x64xf32> -> vector<8x64xf32>
    %151 = arith.addf %148, %150 : vector<8x64xf32>
    %152 = arith.negf %151 : vector<8x64xf32>
    %153 = math.exp %152 : vector<8x64xf32>
    %cst_45 = arith.constant 1.000000e+00 : f32
    %154 = vector.broadcast %cst_45 : f32 to vector<8x64xf32>
    %155 = arith.addf %154, %153 : vector<8x64xf32>
    %156 = arith.divf %154, %155 : vector<8x64xf32>
    %157 = math.tanh %151 : vector<8x64xf32>
    %158 = vector.extract_strided_slice %156 {offsets = [0, 16], sizes = [8, 16], strides = [1, 1]} : vector<8x64xf32> to vector<8x16xf32>
    %159 = arith.mulf %158, %144 : vector<8x16xf32>
    %160 = vector.extract_strided_slice %156 {offsets = [0, 0], sizes = [8, 16], strides = [1, 1]} : vector<8x64xf32> to vector<8x16xf32>
    %161 = vector.extract_strided_slice %157 {offsets = [0, 32], sizes = [8, 16], strides = [1, 1]} : vector<8x64xf32> to vector<8x16xf32>
    %162 = arith.mulf %160, %161 : vector<8x16xf32>
    %163 = arith.addf %159, %162 : vector<8x16xf32>
    %164 = vector.extract_strided_slice %156 {offsets = [0, 48], sizes = [8, 16], strides = [1, 1]} : vector<8x64xf32> to vector<8x16xf32>
    %165 = math.tanh %163 : vector<8x16xf32>
    %166 = arith.mulf %164, %165 : vector<8x16xf32>
    %167 = vector.extract_strided_slice %68 {offsets = [40, 0], sizes = [8, 64], strides = [1, 1]} : vector<88x64xf32> to vector<8x64xf32>
    %168 = arith.truncf %166 : vector<8x16xf32> to vector<8x16xbf16>
    %cst_46 = arith.constant dense<0.000000e+00> : vector<8x64xf32>
    %169 = tpu.matmul %168, %69, %cst_46 {dimension_numbers = #tpu.dot_dimension_numbers<[1], [0], [0], [1], [0, 0, 1, 1], [], []>} : vector<8x16xbf16>, vector<16x64xbf16>, vector<8x64xf32> -> vector<8x64xf32>
    %170 = arith.addf %167, %169 : vector<8x64xf32>
    %171 = arith.negf %170 : vector<8x64xf32>
    %172 = math.exp %171 : vector<8x64xf32>
    %cst_47 = arith.constant 1.000000e+00 : f32
    %173 = vector.broadcast %cst_47 : f32 to vector<8x64xf32>
    %174 = arith.addf %173, %172 : vector<8x64xf32>
    %175 = arith.divf %173, %174 : vector<8x64xf32>
    %176 = math.tanh %170 : vector<8x64xf32>
    %177 = vector.extract_strided_slice %175 {offsets = [0, 16], sizes = [8, 16], strides = [1, 1]} : vector<8x64xf32> to vector<8x16xf32>
    %178 = arith.mulf %177, %163 : vector<8x16xf32>
    %179 = vector.extract_strided_slice %175 {offsets = [0, 0], sizes = [8, 16], strides = [1, 1]} : vector<8x64xf32> to vector<8x16xf32>
    %180 = vector.extract_strided_slice %176 {offsets = [0, 32], sizes = [8, 16], strides = [1, 1]} : vector<8x64xf32> to vector<8x16xf32>
    %181 = arith.mulf %179, %180 : vector<8x16xf32>
    %182 = arith.addf %178, %181 : vector<8x16xf32>
    %183 = vector.extract_strided_slice %175 {offsets = [0, 48], sizes = [8, 16], strides = [1, 1]} : vector<8x64xf32> to vector<8x16xf32>
    %184 = math.tanh %182 : vector<8x16xf32>
    %185 = arith.mulf %183, %184 : vector<8x16xf32>
    %186 = vector.extract_strided_slice %68 {offsets = [48, 0], sizes = [8, 64], strides = [1, 1]} : vector<88x64xf32> to vector<8x64xf32>
    %187 = arith.truncf %185 : vector<8x16xf32> to vector<8x16xbf16>
    %cst_48 = arith.constant dense<0.000000e+00> : vector<8x64xf32>
    %188 = tpu.matmul %187, %69, %cst_48 {dimension_numbers = #tpu.dot_dimension_numbers<[1], [0], [0], [1], [0, 0, 1, 1], [], []>} : vector<8x16xbf16>, vector<16x64xbf16>, vector<8x64xf32> -> vector<8x64xf32>
    %189 = arith.addf %186, %188 : vector<8x64xf32>
    %190 = arith.negf %189 : vector<8x64xf32>
    %191 = math.exp %190 : vector<8x64xf32>
    %cst_49 = arith.constant 1.000000e+00 : f32
    %192 = vector.broadcast %cst_49 : f32 to vector<8x64xf32>
    %193 = arith.addf %192, %191 : vector<8x64xf32>
    %194 = arith.divf %192, %193 : vector<8x64xf32>
    %195 = math.tanh %189 : vector<8x64xf32>
    %196 = vector.extract_strided_slice %194 {offsets = [0, 16], sizes = [8, 16], strides = [1, 1]} : vector<8x64xf32> to vector<8x16xf32>
    %197 = arith.mulf %196, %182 : vector<8x16xf32>
    %198 = vector.extract_strided_slice %194 {offsets = [0, 0], sizes = [8, 16], strides = [1, 1]} : vector<8x64xf32> to vector<8x16xf32>
    %199 = vector.extract_strided_slice %195 {offsets = [0, 32], sizes = [8, 16], strides = [1, 1]} : vector<8x64xf32> to vector<8x16xf32>
    %200 = arith.mulf %198, %199 : vector<8x16xf32>
    %201 = arith.addf %197, %200 : vector<8x16xf32>
    %202 = vector.extract_strided_slice %194 {offsets = [0, 48], sizes = [8, 16], strides = [1, 1]} : vector<8x64xf32> to vector<8x16xf32>
    %203 = math.tanh %201 : vector<8x16xf32>
    %204 = arith.mulf %202, %203 : vector<8x16xf32>
    %205 = vector.extract_strided_slice %68 {offsets = [56, 0], sizes = [8, 64], strides = [1, 1]} : vector<88x64xf32> to vector<8x64xf32>
    %206 = arith.truncf %204 : vector<8x16xf32> to vector<8x16xbf16>
    %cst_50 = arith.constant dense<0.000000e+00> : vector<8x64xf32>
    %207 = tpu.matmul %206, %69, %cst_50 {dimension_numbers = #tpu.dot_dimension_numbers<[1], [0], [0], [1], [0, 0, 1, 1], [], []>} : vector<8x16xbf16>, vector<16x64xbf16>, vector<8x64xf32> -> vector<8x64xf32>
    %208 = arith.addf %205, %207 : vector<8x64xf32>
    %209 = arith.negf %208 : vector<8x64xf32>
    %210 = math.exp %209 : vector<8x64xf32>
    %cst_51 = arith.constant 1.000000e+00 : f32
    %211 = vector.broadcast %cst_51 : f32 to vector<8x64xf32>
    %212 = arith.addf %211, %210 : vector<8x64xf32>
    %213 = arith.divf %211, %212 : vector<8x64xf32>
    %214 = math.tanh %208 : vector<8x64xf32>
    %215 = vector.extract_strided_slice %213 {offsets = [0, 16], sizes = [8, 16], strides = [1, 1]} : vector<8x64xf32> to vector<8x16xf32>
    %216 = arith.mulf %215, %201 : vector<8x16xf32>
    %217 = vector.extract_strided_slice %213 {offsets = [0, 0], sizes = [8, 16], strides = [1, 1]} : vector<8x64xf32> to vector<8x16xf32>
    %218 = vector.extract_strided_slice %214 {offsets = [0, 32], sizes = [8, 16], strides = [1, 1]} : vector<8x64xf32> to vector<8x16xf32>
    %219 = arith.mulf %217, %218 : vector<8x16xf32>
    %220 = arith.addf %216, %219 : vector<8x16xf32>
    %221 = vector.extract_strided_slice %213 {offsets = [0, 48], sizes = [8, 16], strides = [1, 1]} : vector<8x64xf32> to vector<8x16xf32>
    %222 = math.tanh %220 : vector<8x16xf32>
    %223 = arith.mulf %221, %222 : vector<8x16xf32>
    %224 = vector.extract_strided_slice %68 {offsets = [64, 0], sizes = [8, 64], strides = [1, 1]} : vector<88x64xf32> to vector<8x64xf32>
    %225 = arith.truncf %223 : vector<8x16xf32> to vector<8x16xbf16>
    %cst_52 = arith.constant dense<0.000000e+00> : vector<8x64xf32>
    %226 = tpu.matmul %225, %69, %cst_52 {dimension_numbers = #tpu.dot_dimension_numbers<[1], [0], [0], [1], [0, 0, 1, 1], [], []>} : vector<8x16xbf16>, vector<16x64xbf16>, vector<8x64xf32> -> vector<8x64xf32>
    %227 = arith.addf %224, %226 : vector<8x64xf32>
    %228 = arith.negf %227 : vector<8x64xf32>
    %229 = math.exp %228 : vector<8x64xf32>
    %cst_53 = arith.constant 1.000000e+00 : f32
    %230 = vector.broadcast %cst_53 : f32 to vector<8x64xf32>
    %231 = arith.addf %230, %229 : vector<8x64xf32>
    %232 = arith.divf %230, %231 : vector<8x64xf32>
    %233 = math.tanh %227 : vector<8x64xf32>
    %234 = vector.extract_strided_slice %232 {offsets = [0, 16], sizes = [8, 16], strides = [1, 1]} : vector<8x64xf32> to vector<8x16xf32>
    %235 = arith.mulf %234, %220 : vector<8x16xf32>
    %236 = vector.extract_strided_slice %232 {offsets = [0, 0], sizes = [8, 16], strides = [1, 1]} : vector<8x64xf32> to vector<8x16xf32>
    %237 = vector.extract_strided_slice %233 {offsets = [0, 32], sizes = [8, 16], strides = [1, 1]} : vector<8x64xf32> to vector<8x16xf32>
    %238 = arith.mulf %236, %237 : vector<8x16xf32>
    %239 = arith.addf %235, %238 : vector<8x16xf32>
    %240 = vector.extract_strided_slice %232 {offsets = [0, 48], sizes = [8, 16], strides = [1, 1]} : vector<8x64xf32> to vector<8x16xf32>
    %241 = math.tanh %239 : vector<8x16xf32>
    %242 = arith.mulf %240, %241 : vector<8x16xf32>
    %243 = vector.extract_strided_slice %68 {offsets = [72, 0], sizes = [8, 64], strides = [1, 1]} : vector<88x64xf32> to vector<8x64xf32>
    %244 = arith.truncf %242 : vector<8x16xf32> to vector<8x16xbf16>
    %cst_54 = arith.constant dense<0.000000e+00> : vector<8x64xf32>
    %245 = tpu.matmul %244, %69, %cst_54 {dimension_numbers = #tpu.dot_dimension_numbers<[1], [0], [0], [1], [0, 0, 1, 1], [], []>} : vector<8x16xbf16>, vector<16x64xbf16>, vector<8x64xf32> -> vector<8x64xf32>
    %246 = arith.addf %243, %245 : vector<8x64xf32>
    %247 = arith.negf %246 : vector<8x64xf32>
    %248 = math.exp %247 : vector<8x64xf32>
    %cst_55 = arith.constant 1.000000e+00 : f32
    %249 = vector.broadcast %cst_55 : f32 to vector<8x64xf32>
    %250 = arith.addf %249, %248 : vector<8x64xf32>
    %251 = arith.divf %249, %250 : vector<8x64xf32>
    %252 = math.tanh %246 : vector<8x64xf32>
    %253 = vector.extract_strided_slice %251 {offsets = [0, 16], sizes = [8, 16], strides = [1, 1]} : vector<8x64xf32> to vector<8x16xf32>
    %254 = arith.mulf %253, %239 : vector<8x16xf32>
    %255 = vector.extract_strided_slice %251 {offsets = [0, 0], sizes = [8, 16], strides = [1, 1]} : vector<8x64xf32> to vector<8x16xf32>
    %256 = vector.extract_strided_slice %252 {offsets = [0, 32], sizes = [8, 16], strides = [1, 1]} : vector<8x64xf32> to vector<8x16xf32>
    %257 = arith.mulf %255, %256 : vector<8x16xf32>
    %258 = arith.addf %254, %257 : vector<8x16xf32>
    %259 = vector.extract_strided_slice %251 {offsets = [0, 48], sizes = [8, 16], strides = [1, 1]} : vector<8x64xf32> to vector<8x16xf32>
    %260 = math.tanh %258 : vector<8x16xf32>
    %261 = arith.mulf %259, %260 : vector<8x16xf32>
    %262 = vector.extract_strided_slice %68 {offsets = [80, 0], sizes = [8, 64], strides = [1, 1]} : vector<88x64xf32> to vector<8x64xf32>
    %263 = arith.truncf %261 : vector<8x16xf32> to vector<8x16xbf16>
    %cst_56 = arith.constant dense<0.000000e+00> : vector<8x64xf32>
    %264 = tpu.matmul %263, %69, %cst_56 {dimension_numbers = #tpu.dot_dimension_numbers<[1], [0], [0], [1], [0, 0, 1, 1], [], []>} : vector<8x16xbf16>, vector<16x64xbf16>, vector<8x64xf32> -> vector<8x64xf32>
    %265 = arith.addf %262, %264 : vector<8x64xf32>
    %266 = arith.negf %265 : vector<8x64xf32>
    %267 = math.exp %266 : vector<8x64xf32>
    %cst_57 = arith.constant 1.000000e+00 : f32
    %268 = vector.broadcast %cst_57 : f32 to vector<8x64xf32>
    %269 = arith.addf %268, %267 : vector<8x64xf32>
    %270 = arith.divf %268, %269 : vector<8x64xf32>
    %271 = math.tanh %265 : vector<8x64xf32>
    %272 = vector.extract_strided_slice %270 {offsets = [0, 16], sizes = [8, 16], strides = [1, 1]} : vector<8x64xf32> to vector<8x16xf32>
    %273 = arith.mulf %272, %258 : vector<8x16xf32>
    %274 = vector.extract_strided_slice %270 {offsets = [0, 0], sizes = [8, 16], strides = [1, 1]} : vector<8x64xf32> to vector<8x16xf32>
    %275 = vector.extract_strided_slice %271 {offsets = [0, 32], sizes = [8, 16], strides = [1, 1]} : vector<8x64xf32> to vector<8x16xf32>
    %276 = arith.mulf %274, %275 : vector<8x16xf32>
    %277 = arith.addf %273, %276 : vector<8x16xf32>
    %278 = vector.extract_strided_slice %270 {offsets = [0, 48], sizes = [8, 16], strides = [1, 1]} : vector<8x64xf32> to vector<8x16xf32>
    %279 = math.tanh %277 : vector<8x16xf32>
    %280 = arith.mulf %278, %279 : vector<8x16xf32>
    %cst_58 = arith.constant 0.000000e+00 : f32
    %281 = vector.broadcast %cst_58 : f32 to vector<8x16xf32>
    %282 = arith.maximumf %280, %281 : vector<8x16xf32>
    %c0_59 = arith.constant 0 : index
    %c0_60 = arith.constant 0 : index
    %283 = vector.load %arg5[%c0_59, %c0_60] : memref<8x32xf32, #tpu.memory_space<vmem>>, vector<8x16xf32>
    tpu.vector_store %arg5[%c0_59, %c0_60], %56 {strides = array<i32>} : memref<8x32xf32, #tpu.memory_space<vmem>>, vector<8x16xf32>,
    %c0_61 = arith.constant 0 : index
    %c16 = arith.constant 16 : index
    %284 = vector.load %arg5[%c0_61, %c16] : memref<8x32xf32, #tpu.memory_space<vmem>>, vector<8x16xf32>
    tpu.vector_store %arg5[%c0_61, %c16], %282 {strides = array<i32>} : memref<8x32xf32, #tpu.memory_space<vmem>>, vector<8x16xf32>,
    return
  }
}

</mosaic_0001>

<bundles_post_ra>
// kernel: forward.1
= control target key start
LH: loop header
LB: loop body
LE: loop exit
PB: predicated region body
PF: predicated region fallthrough
CT: control target
= control target key end

     0   :  { %vm82_vm0 = vcmask 1040384   ;;  %v2747_v1 = vmov 0   ;;  %vm78_vm1 = vcmask 400384   ;;  %vm412_vm2 = vcmask 1041408   ;;  %s2752_s23 = smov 96   ;;  %s2754_s24 = smov 32   ;;  %s3381_s0 = inlined_call_operand.vmem [shape: bf16[272,294], index: 0, kind: input, shape index: {}]   ;;  %s3382_s3 = inlined_call_operand.vmem [shape: f32[16,51], index: 3, kind: input, shape index: {}]   ;;  %s3383_s1 = inlined_call_operand.vmem [shape: bf16[784,64], index: 1, kind: input, shape index: {}]   ;;  %s3384_s2 = inlined_call_operand.vmem [shape: f32[8,294], index: 2, kind: input, shape index: {}]   ;;  %s3385_s4 = inlined_call_operand.vmem [shape: s32[88,1], index: 4, kind: input, shape index: {}]   ;;  %s3386_s5 = inlined_call_operand.vmem [shape: f32[8,32], index: 5, kind: output, shape index: {}]  }
   0x1   :  { %v30_v0 = vld [vmem:[%s3381_s0 + $0x48] sm:$0x11]  ;;  %v84_v2 = vsel %vm82_vm0, 65535, %v2747_v1  ;;  %123 = vmatprep.mubr.bf16.mxu0 %v2747_v1  ;;  %2546 = vset.pattern.permute.xlu1 %v2747_v1  ;;  %v2550_v7 = vld [vmem:[%s3381_s0 + $0x34] ss:$12 sps:$4 sm:$0xff]   ;;  %v2748_v59 = vmov 0.0   ;;  %v33_v60 = vlaneseq }
   0x2   :  { %v2180_v3 = vcombine.high %v30_v0, %v30_v0  ;;  %v2179_v4 = vcombine.low %v30_v0, %v30_v0  ;;  %v2552_v8 = vld [vmem:[%s3381_s0 + $0x30] ss:$12 sps:$4 sm:$0xff]   ;;  %v2559_v9 = vld [vmem:[%s3381_s0 + $0x10c] ss:$12 sps:$4 sm:$0xff]   ;;  %v2561_v10 = vld [vmem:[%s3381_s0 + $0x108] ss:$12 sps:$4 sm:$0xff]  }
   0x3   :  { %v2553_v11 = vld [vmem:[%s3381_s0 + $0x1c] ss:$12 sps:$4 sm:$0xff]   ;;  %422 = vmatprep.subr.bf16.mxu1 %v2559_v9  ;;  %v2563_v12 = vld [vmem:[%s3381_s0 + $0xf4] ss:$12 sps:$4 sm:$0xff]   ;;  %v2555_v14 = vld [vmem:[%s3381_s0 + $0x18] ss:$12 sps:$4 sm:$0xff]  }
   0x4   :  { %v89_v5 = vand.u32 %v2180_v3, %v84_v2  ;;  %v86_v6 = vand.u32 %v2179_v4, %v84_v2  ;;  %423 = vmatpush1.bf16.msra.mxu1 %v2561_v10  ;;  %v2565_v13 = vld [vmem:[%s3381_s0 + $0xf0] ss:$12 sps:$4 sm:$0xff]   ;;  %v2558_v17 = vld [vmem:[%s3381_s0] ss:$12 sps:$4 sm:$0xff]   ;;  %v2569_v19 = vld [vmem:[%s3381_s0 + $0xd8] ss:$12 sps:$4 sm:$0xff]  }
   0x5   :  { %424 = vmatprep.subr.bf16.mxu1 %v2563_v12  ;;  %v2567_v15 = vld [vmem:[%s3381_s0 + $0xdc] ss:$12 sps:$4 sm:$0xff]   ;;  %v2556_v16 = vld [vmem:[%s3381_s0 + $0x4] ss:$12 sps:$4 sm:$0xff]   ;;  %v2573_v22 = vld [vmem:[%s3381_s0 + $0xc0] ss:$12 sps:$4 sm:$0xff]  }
   0x6   :  { %99 = vmatprep.subr.bf16.mxu0 %v89_v5  ;;  %v2829_v18 = vld [vmem:[%s3382_s3] sm:$0xff]  ;;  %v22_v21 = vld [vmem:[%s3382_s3 + $0x8] sm:$0xff]  ;;  %v2562_v25 = vld [vmem:[%s3381_s0 + $0x110] ss:$12 sps:$4 sm:$0xff]   ;;  %v2955_v61 = vshrl.u32 %v33_v60, 7  ;;  %vm708_vm3 = vcmask 1042432  }
   0x7   :  { %100 = vmatpush1.bf16.msra.mxu0 %v86_v6  ;;  %v2571_v20 = vld [vmem:[%s3381_s0 + $0xc4] ss:$12 sps:$4 sm:$0xff]   ;;  %v23_v23 = vpack.c.bf16 %v22_v21, %v2829_v18  ;;  %v2575_v24 = vld [vmem:[%s3381_s0 + $0xac] ss:$12 sps:$4 sm:$0xff]   ;;  %v2577_v26 = vld [vmem:[%s3381_s0 + $0xa8] ss:$12 sps:$4 sm:$0xff]  }
   0x8   :  { %101 = vmatprep.subr.bf16.mxu0 %v2550_v7  ;;  %425 = vmatpush1.bf16.msra.mxu1 %v2565_v13  ;;  %v2579_v27 = vld [vmem:[%s3381_s0 + $0x94] ss:$12 sps:$4 sm:$0xff]   ;;  %v2566_v28 = vld [vmem:[%s3381_s0 + $0xf8] ss:$12 sps:$4 sm:$0xff]   ;;  %v2581_v29 = vld [vmem:[%s3381_s0 + $0x90] ss:$12 sps:$4 sm:$0xff]  }
   0x9   :  { %426 = vmatprep.subr.bf16.mxu1 %v2567_v15  ;;  %v2583_v30 = vld [vmem:[%s3381_s0 + $0x7c] ss:$12 sps:$4 sm:$0xff]   ;;  %v2570_v31 = vld [vmem:[%s3381_s0 + $0xe0] ss:$12 sps:$4 sm:$0xff]   ;;  %v2585_v32 = vld [vmem:[%s3381_s0 + $0x78] ss:$12 sps:$4 sm:$0xff]  }
   0xa   :  { %v2587_v33 = vld [vmem:[%s3381_s0 + $0x64] ss:$12 sps:$4 sm:$0xff]   ;;  %v2574_v34 = vld [vmem:[%s3381_s0 + $0xc8] ss:$12 sps:$4 sm:$0xff]   ;;  %v2589_v36 = vld [vmem:[%s3381_s0 + $0x60] ss:$12 sps:$4 sm:$0xff]  }
   0xb   :  { %102 = vmatpush1.bf16.msra.mxu0 %v2552_v8  ;;  %v188_v35 = vld [vmem:[%s3381_s0 + $0x180] sm:$0x33]  ;;  %v2578_v39 = vld [vmem:[%s3381_s0 + $0xb0] ss:$12 sps:$4 sm:$0xff]   ;;  %v2594_v41 = vld [vmem:[%s3381_s0 + $0x16c] ss:$12 sps:$4 sm:$0xff]  }
   0xc   :  { %103 = vmatprep.subr.bf16.mxu0 %v2553_v11  ;;  %427 = vmatpush1.bf16.msra.mxu1 %v2569_v19  ;;  %v2220_v37 = vcombine.high %v188_v35, %v188_v35  ;;  %v2219_v38 = vcombine.low %v188_v35, %v188_v35  ;;  %v2582_v42 = vld [vmem:[%s3381_s0 + $0x98] ss:$12 sps:$4 sm:$0xff]   ;;  %v2596_v43 = vld [vmem:[%s3381_s0 + $0x168] ss:$12 sps:$4 sm:$0xff]   ;;  %v2586_v44 = vld [vmem:[%s3381_s0 + $0x80] ss:$12 sps:$4 sm:$0xff]  }
   0xd   :  { %428 = vmatprep.subr.bf16.mxu1 %v2571_v20  ;;  %v2590_v45 = vld [vmem:[%s3381_s0 + $0x68] ss:$12 sps:$4 sm:$0xff]   ;;  %v2597_v48 = vld [vmem:[%s3381_s0 + $0x170] ss:$12 sps:$4 sm:$0xff]   ;;  %v2601_v51 = vld [vmem:[%s3381_s0 + $0x158] ss:$12 sps:$4 sm:$0xff]  }
   0xe   :  { %v414_v40 = vsel %vm412_vm2, %v2219_v38, 0  ;;  %v2593_v46 = vld [vmem:[%s3381_s0 + $0x188] ss:$0 sps:$4 sm:$0x33]   ;;  %v2598_v49 = vld [vmem:[%s3381_s0 + $0x154] ss:$12 sps:$4 sm:$0xff]  }
   0xf   :  { %104 = vmatpush1.bf16.msra.mxu0 %v2555_v14  ;;  %v420_v47 = vsel %vm412_vm2, %v2593_v46, 0  ;;  %v2600_v50 = vld [vmem:[%s3381_s0 + $0x150] ss:$12 sps:$4 sm:$0xff]   ;;  %v2604_v53 = vld [vmem:[%s3381_s0 + $0x138] ss:$12 sps:$4 sm:$0xff]   ;;  %v39_v62 = vsub.s32 1, %v2955_v61 }
  0x10   :  { %105 = vmatprep.subr.bf16.mxu0 %v2556_v16  ;;  %429 = vmatpush1.bf16.msra.mxu1 %v2573_v22  ;;  %v2602_v52 = vld [vmem:[%s3381_s0 + $0x13c] ss:$12 sps:$4 sm:$0xff]   ;;  %v2605_v54 = vld [vmem:[%s3381_s0 + $0x140] ss:$12 sps:$4 sm:$0xff]   ;;  %v2606_v55 = vld [vmem:[%s3381_s0 + $0x124] ss:$12 sps:$4 sm:$0xff]  }
  0x11   :  { %430 = vmatprep.subr.bf16.mxu1 %v2575_v24  ;;  %v2608_v56 = vld [vmem:[%s3381_s0 + $0x120] ss:$12 sps:$4 sm:$0xff]   ;;  %v2609_v57 = vld [vmem:[%s3381_s0 + $0x128] ss:$12 sps:$4 sm:$0xff]   ;;  %v35_v63 = vsub.s32 0, %v2955_v61  ;;  %vm408_vm4 = vcmask 556032  }
  0x12   :  { %v2610_v58 = vld [vmem:[%s3383_s1 + $0x110] sm:$0xff]   ;;  %v31_v0 = vld [vmem:[%s3384_s2] ss:$8 sm:$0x3]  ;;  %v2626_v35 = vld [vmem:[%s3383_s1 + $0x118] sm:$0xff]   ;;  %vm2749_vm5 = vmmov 0  }
  0x13   :  { %106 = vmatpush1.bf16.msra.mxu0 %v2558_v17  ;;  %v40_v3 = vrot.slane %v31_v0, %v39_v62  ;;  %v36_v4 = vrot.slane %v31_v0, %v35_v63  ;;  %v2620_v13 = vld [vmem:[%s3383_s1 + $0x128] ss:$0 sps:$4 sm:$0x77]   ;;  %v2611_v19 = vld [vmem:[%s3383_s1 + $0xd0] sm:$0xff]   ;;  %v2614_v24 = vld [vmem:[%s3383_s1 + $0x100] sm:$0xff]   ;;  %vm704_vm6 = vcmask 310272  }
  0x14   :  { %465 = vmatprep.subr.bf16.mxu0 %v2747_v1  ;;  %431 = vmatpush1.bf16.msra.mxu1 %v2577_v26  ;;  %v2612_v21 = vld [vmem:[%s3383_s1 + $0x108] sm:$0xff]   ;;  %v710_v22 = vsel %vm708_vm3, %v2620_v13, 0  ;;  %v2616_v26 = vld [vmem:[%s3383_s1 + $0xf8] sm:$0xff]   ;;  %v2637_v13 = vld [vmem:[%s3383_s1 + $0x60] sm:$0xff]   ;;  %vm1041_vm7 = vcmask 523264   ;;  %vm1262_vm10 = vcmask 408576  }
  0x15   :  { %432 = vmatprep.subr.bf16.mxu1 %v2579_v27  ;;  %v2617_v27 = vld [vmem:[%s3383_s1 + $0xb8] sm:$0xff]   ;;  %vm1104_vm13 = vcmask 261120   ;;  %vm1372_vm14 = vcmask 130048   ;;  %s2755_s25 = smov 80  }
  0x16   :  { %2181 = vmatmul.mubr.msk.bf16.vlgmr.msra.gmra.mxu0 %vm78_vm1, %v23_v23  ;;  %v2613_v23 = vld [vmem:[%s3383_s1 + $0xc8] sm:$0xff]   ;;  %v2629_v38 = vld [vmem:[%s3383_s1 + $0x78] sm:$0xff]  }
  0x17   :  { %466 = vmatpush1.bf16.msra.mxu0 %v2562_v25  ;;  %v2615_v25 = vld [vmem:[%s3383_s1 + $0xc0] sm:$0xff]  }
  0x18   :  { %467 = vmatprep.subr.bf16.mxu0 %v2747_v1  ;;  %433 = vmatpush1.bf16.msra.mxu1 %v2581_v29  ;;  %v2619_v29 = vld [vmem:[%s3383_s1 + $0xb0] sm:$0xff]  }
  0x19   :  { %434 = vmatprep.subr.bf16.mxu1 %v2583_v30  ;;  %v2621_v30 = vld [vmem:[%s3383_s1 + $0xe8] sm:$0xff]  }
  0x1b   :  { %468 = vmatpush1.bf16.msra.mxu0 %v2566_v28  ;;  %v2618_v28 = vld [vmem:[%s3383_s1 + $0xf0] sm:$0xff]  }
  0x1c   :  { %469 = vmatprep.subr.bf16.mxu0 %v2747_v1  ;;  %435 = vmatpush1.bf16.msra.mxu1 %v2585_v32  ;;  %v2623_v32 = vld [vmem:[%s3383_s1 + $0x120] sm:$0xff]  }
  0x1d   :  { %436 = vmatprep.subr.bf16.mxu1 %v2587_v33  ;;  %v2624_v33 = vld [vmem:[%s3383_s1 + $0xe0] sm:$0xff]  }
  0x1f   :  { %470 = vmatpush1.bf16.msra.mxu0 %v2570_v31  ;;  %v2622_v31 = vld [vmem:[%s3383_s1 + $0xa8] sm:$0xff]  }
  0x20   :  { %471 = vmatprep.subr.bf16.mxu0 %v2747_v1  ;;  %437 = vmatpush1.bf16.msra.mxu1 %v2589_v36  ;;  %v2627_v36 = vld [vmem:[%s3383_s1 + $0xd8] sm:$0xff]  }
  0x21   :  { %2222 = vmatprep.subr.msk.bf16.mxu1 %vm412_vm2, %v2220_v37  ;;  %v2628_v37 = vld [vmem:[%s3383_s1 + $0x98] sm:$0xff]  }
  0x23   :  { %472 = vmatpush1.bf16.msra.mxu0 %v2574_v34  ;;  %v2625_v34 = vld [vmem:[%s3383_s1 + $0xa0] sm:$0xff]  }
  0x24   :  { %473 = vmatprep.subr.bf16.mxu0 %v2747_v1  ;;  %445 = vmatpush2.bf16.msra.mxu1 %v414_v40  ;;  %v2751_v40 = vmov 50  }
  0x25   :  { %446 = vmatprep.subr.bf16.mxu1 %v2594_v41  ;;  %v2182_v41 = vld [vmem:[%s3384_s2 + $0x1] ss:$8 sm:$0x7] }
  0x27   :  { %474 = vmatpush1.bf16.msra.mxu0 %v2578_v39  ;;  %v2750_v39 = vmov 49  }
  0x28   :  { %475 = vmatprep.subr.bf16.mxu0 %v2747_v1  ;;  %447 = vmatpush2.bf16.msra.mxu1 %v2596_v43 }
  0x29   :  { %448 = vmatprep.subr.bf16.mxu1 %v2598_v49  ;;  %2544 = vset.pattern.permute.xlu0 %v2750_v39  ;;  %v2656_v39 = vld [vmem:[%s3383_s1 + $0x160] sm:$0xff]  }
  0x2a   :  { %992 = vperm.xlu0 %2544, %v2829_v18  }
  0x2b   :  { %476 = vmatpush1.bf16.msra.mxu0 %v2582_v42  ;;  %v200_v42 = vrot.slane %v2182_v41, %v39_v62  ;;  %v2630_v62 = vld [vmem:[%s3383_s1 + $0x38] sm:$0xff]  }
  0x2c   :  { %477 = vmatprep.subr.bf16.mxu0 %v2747_v1  ;;  %449 = vmatpush2.bf16.msra.mxu1 %v2600_v50 }
  0x2d   :  { %450 = vmatprep.subr.bf16.mxu1 %v2602_v52 }
  0x2e   :  { %2545 = vset.pattern.permute.xlu0 %v2751_v40 }
  0x2f   :  { %478 = vmatpush1.bf16.msra.mxu0 %v2586_v44  ;;  %999 = vperm.xlu0 %2545, %v2829_v18   ;;  %v203_v44 = vsub.s32 2, %v2955_v61 }
  0x30   :  { %479 = vmatprep.subr.bf16.mxu0 %v2747_v1  ;;  %451 = vmatpush2.bf16.msra.mxu1 %v2604_v53 }
  0x31   :  { %452 = vmatprep.subr.bf16.mxu1 %v2606_v55  ;;  %v204_v49 = vrot.slane %v2182_v41, %v203_v44 }
  0x33   :  { %480 = vmatpush1.bf16.msra.mxu0 %v2590_v45  ;;  %2547 = vset.pattern.permute.xlu0 %v2747_v1 }
  0x34   :  { %487 = vmatprep.subr.bf16.mxu0 %v2747_v1  ;;  %453 = vmatpush2.bf16.msra.mxu1 %v2608_v56 }
  0x35   :  { %2316 = vmatprep.subr.bf16.mxu1 %v2610_v58 }
  0x37   :  { %488 = vmatpush2.bf16.msra.mxu0 %v420_v47 }
  0x38   :  { %489 = vmatprep.subr.bf16.mxu0 %v2747_v1 }
  0x3b   :  { %490 = vmatpush2.bf16.msra.mxu0 %v2597_v48  ;;  %v3042_v48 = vrot.slane %v2182_v41, %v35_v63  ;;  %v2632_v63 = vld [vmem:[%s3383_s1 + $0x90] ss:$0 sps:$4 sm:$0x77]  }
  0x3c   :  { %491 = vmatprep.subr.bf16.mxu0 %v2747_v1 }
  0x3f   :  { %492 = vmatpush2.bf16.msra.mxu0 %v2601_v51 }
  0x40   :  { %493 = vmatprep.subr.bf16.mxu0 %v2747_v1 }
  0x43   :  { %494 = vmatpush2.bf16.msra.mxu0 %v2605_v54 }
  0x44   :  { %495 = vmatprep.subr.bf16.mxu0 %v2747_v1 }
  0x47   :  { %496 = vmatpush2.bf16.msra.mxu0 %v2609_v57 }
  0x48   :  { %2408 = vmatprep.subr.bf16.mxu0 %v2748_v59 }
  0xd6   :  { %v125_v2 = vpop.f32.mrf.mxu0 }
  0xd7   :  { %v126_v9 = vadd.f32 %v125_v2, %v36_v4 }
  0xd8   :  { %v127_v5 = vpop.f32.mrf.mxu0 }
  0xd9   :  { %v128_v7 = vadd.f32 %v127_v5, %v40_v3  ;;  %v134_v16 = vmax.f32 %v126_v9, 0.0  ;;  %v2634_v9 = vld [vmem:[%s3383_s1 + $0x68] sm:$0xff]  }
  0xda   :  { %v129_v6 = vpop.f32.mrf.mxu0 }
  0xdb   :  { %v130_v8 = vadd.f32 %v129_v6, %v36_v4  ;;  %v135_v14 = vmax.f32 %v128_v7, 0.0  ;;  %v907_v7 = vsel %vm708_vm3, %v2632_v63, 0 }
  0xdc   :  { %v131_v10 = vpop.f32.mrf.mxu0 }
  0xdd   :  { %v132_v11 = vadd.f32 %v131_v10, %v40_v3  ;;  %v136_v12 = vmax.f32 %v130_v8, 0.0  ;;  %v2631_v3 = vld [vmem:[%s3383_s1 + $0x70] sm:$0xff]   ;;  %v2635_v10 = vld [vmem:[%s3383_s1 + $0x88] sm:$0xff]  }
  0xde   :  { %v2633_v8 = vld [vmem:[%s3383_s1 + $0x30] sm:$0xff]  }
  0xdf   :  { %v137_v15 = vmax.f32 %v132_v11, 0.0  ;;  %v138_v20 = vpack.c.bf16 %v136_v12, %v134_v16  ;;  %v2636_v12 = vld [vmem:[%s3383_s1 + $0x28] sm:$0xff]   ;;  %v2639_v16 = vld [vmem:[%s3383_s1 + $0x20] sm:$0xff]  }
  0xe1   :  { %v139_v17 = vpack.c.bf16 %v137_v15, %v135_v14  ;;  %v2638_v14 = vld [vmem:[%s3383_s1 + $0x80] sm:$0xff]  }
  0xe3   :  { %2223 = vmatprep.mubr.msk.bf16.mxu1 %vm408_vm4, %v139_v17  ;;  %2224 = vmatprep.mubr.msk.bf16.mxu0 %vm408_vm4, %v139_v17  ;;  %v2640_v17 = vld [vmem:[%s3383_s1 + $0x58] sm:$0xff]  }
  0xe4   :  { %455 = vmatmul.mubr.bf16.vlgmr.msra.gmra.mxu1 %v138_v20  ;;  %498 = vmatmul.mubr.bf16.vlgmr.msra.gmra.mxu0 %v138_v20  ;;  %v2641_v20 = vld [vmem:[%s3383_s1 + $0x18] sm:$0xff]  }
  0xe5   :  { %2317 = vmatpush3.bf16.msra.mxu1 %v2611_v19  ;;  %2409 = vmatpush3.bf16.msra.mxu0 %v710_v22  ;;  %v2643_v22 = vld [vmem:[%s3383_s1 + $0x10] sm:$0xff]  }
  0xe6   :  { %2318 = vmatprep.subr.bf16.mxu1 %v2612_v21  ;;  %2410 = vmatprep.subr.bf16.mxu0 %v2748_v59  ;;  %v2642_v21 = vld [vmem:[%s3383_s1 + $0x50] sm:$0xff]  }
  0xe7   :  { %2414 = vmatprep.mubr.msk.bf16.mxu0 %vm2749_vm5, %v2748_v59 }
  0xe9   :  { %2319 = vmatpush3.bf16.msra.mxu1 %v2613_v23  ;;  %2411 = vmatpush3.bf16.msra.mxu0 %v2623_v32  ;;  %v2644_v23 = vld [vmem:[%s3383_s1 + $0x48] sm:$0xff]   ;;  %v2650_v32 = vld [vmem:[%s3383_s1 + $0x140] sm:$0xff]  }
  0xea   :  { %2320 = vmatprep.subr.bf16.mxu1 %v2614_v24  ;;  %2412 = vmatprep.subr.bf16.mxu0 %v2748_v59  ;;  %v2645_v24 = vld [vmem:[%s3383_s1 + $0x8] sm:$0xff]  }
  0xed   :  { %2321 = vmatpush3.bf16.msra.mxu1 %v2615_v25  ;;  %2413 = vmatpush3.bf16.msra.mxu0 %v2626_v35  ;;  %v1148_v35 = vld [vmem:[%s3385_s4] sm:$0xff] }
  0xee   :  { %2322 = vmatprep.subr.bf16.mxu1 %v2616_v26  ;;  %2342 = vmatprep.subr.bf16.mxu0 %v2629_v38  ;;  %v2646_v26 = vld [vmem:[%s3383_s1 + $0x40] sm:$0xff]   ;;  %v1150_v38 = vld [vmem:[%s3385_s4 + $0x10] sm:$0xff] }
  0xef   :  { %1162 = vperm.xlu1 %2546, %v1148_v35  }
  0xf1   :  { %2323 = vmatpush3.bf16.msra.mxu1 %v2617_v27  ;;  %v2647_v27 = vld [vmem:[%s3383_s1] sm:$0xff]  }
  0xf2   :  { %2324 = vmatprep.subr.bf16.mxu1 %v2618_v28 }
  0xf5   :  { %2325 = vmatpush3.bf16.msra.mxu1 %v2619_v29 }
  0xf6   :  { %2326 = vmatprep.subr.bf16.mxu1 %v2621_v30  ;;  %v2648_v30 = vld [vmem:[%s3383_s1 + $0x150] sm:$0xff]  }
  0xf9   :  { %2327 = vmatpush3.bf16.msra.mxu1 %v2622_v31  ;;  %v2649_v31 = vld [vmem:[%s3383_s1 + $0x148] sm:$0xff]  }
  0xfa   :  { %2328 = vmatprep.subr.bf16.mxu1 %v2624_v33  ;;  %v2651_v33 = vld [vmem:[%s3383_s1 + $0x138] sm:$0xff]  }
  0xfd   :  { %2329 = vmatpush3.bf16.msra.mxu1 %v2625_v34  ;;  %v2652_v34 = vld [vmem:[%s3383_s1 + $0x180] ss:$0 sps:$4 sm:$0x11]  }
  0xfe   :  { %2330 = vmatprep.subr.bf16.mxu1 %v2627_v36  ;;  %v1151_v36 = vld [vmem:[%s3385_s4 + $0x18] sm:$0xff] }
  0xff   :  { %1171 = vperm.xlu0 %2547, %v1151_v36   ;;  %v1091_v36 = vld [vmem:[%s3384_s2 + $0x6] ss:$0 sm:$0xff] }
 0x101   :  { %2331 = vmatpush3.bf16.msra.mxu1 %v2628_v37  ;;  %v1149_v37 = vld [vmem:[%s3385_s4 + $0x8] sm:$0xff] }
 0x102   :  { %2418 = vmatprep.subr.bf16.mxu1 %v2748_v59  ;;  %1165 = vperm.xlu1 %2546, %v1149_v37  }
 0x106   :  { %1168 = vperm.xlu1 %2546, %v1150_v38  }
 0x1a4   :  { %v3037_v43 = vpop.f32.mrf.mxu1  ;;  %v499_v45 = vpop.f32.mrf.mxu0 }
 0x1a5   :  { %v500_v11 = vadd.f32 %v499_v45, %v204_v49  ;;  %v457_v25 = vadd.f32 %v3037_v43, %v3042_v48 }
 0x1a6   :  { %v458_v46 = vpop.f32.mrf.mxu1  ;;  %v501_v47 = vpop.f32.mrf.mxu0 }
 0x1a7   :  { %v459_v18 = vadd.f32 %v458_v46, %v200_v42  ;;  %v508_v15 = vmax.f32 %v500_v11, 0.0  ;;  %v506_v28 = vmax.f32 %v457_v25, 0.0  ;;  %v1163_v11 = vpop.permute.xlu1 %1162 }
 0x1a8   :  { %v460_v50 = vpop.f32.mrf.mxu1  ;;  %v502_v51 = vpop.f32.mrf.mxu0 }
 0x1a9   :  { %v461_v52 = vadd.f32 %v460_v50, %v3042_v48  ;;  %v503_v53 = vadd.f32 %v502_v51, %v204_v49  ;;  %v507_v56 = vmax.f32 %v459_v18, 0.0  ;;  %v515_v19 = vpack.c.bf16 %v508_v15, %v508_v15  ;;  %v993_v51 = vpop.permute.xlu0 %992 }
 0x1aa   :  { %v462_v54 = vpop.f32.mrf.mxu1  ;;  %v504_v55 = vpop.f32.mrf.mxu0  ;;  %v513_v29 = vpack.c.bf16 %v506_v28, %v506_v28  ;;  %v1016_v28 = vld [vmem:[%s3384_s2 + $0x5] ss:$0 sm:$0xff] }
 0x1ab   :  { %v463_v57 = vadd.f32 %v462_v54, %v200_v42  ;;  %v511_v58 = vmax.f32 %v503_v53, 0.0  ;;  %v509_v0 = vmax.f32 %v461_v52, 0.0  ;;  %v514_v4 = vpack.c.bf16 %v507_v56, %v507_v56 }
 0x1ad   :  { %v510_v61 = vmax.f32 %v463_v57, 0.0  ;;  %v555_v2 = vpack.c.bf16 %v511_v58, %v511_v58  ;;  %v553_v6 = vpack.c.bf16 %v509_v0, %v509_v0  ;;  %v989_v57 = vld [vmem:[%s3384_s2 + $0x3] ss:$0 sm:$0xff]  ;;  %v997_v0 = vld [vmem:[%s3384_s2 + $0x4] ss:$0 sm:$0xff] }
 0x1af   :  { %v554_v5 = vpack.c.bf16 %v510_v61, %v510_v61  ;;  %2415 = vmatmul.mubr.msk.bf16.vlgmr.msra.gmra.mxu0 %vm704_vm6, %v555_v2 }
 0x1b0   :  { %2343 = vmatpush3.bf16.msra.mxu0 %v2630_v62  ;;  %941 = vmatprep.mubr.bf16.mxu0 %v514_v4  ;;  %v1000_v62 = vpop.permute.xlu0 %999 }
 0x1b1   :  { %744 = vmatprep.mubr.bf16.mxu1 %v554_v5  ;;  %2344 = vmatprep.subr.bf16.mxu0 %v2631_v3  ;;  %v995_v3 = vmul.f32 %v993_v51, %v989_v57  ;;  %v1002_v4 = vmul.f32 %v1000_v62, %v997_v0 }
 0x1b2   :  { %745 = vmatmul.mubr.bf16.vlgmr.msra.gmra.mxu1 %v553_v6  ;;  %v1004_v6 = vld [vmem:[%s3384_s2 + $0x2] ss:$0 sm:$0xff] }
 0x1b3   :  { %2419 = vmatpush3.bf16.msra.mxu1 %v907_v7  ;;  %2424 = vmatprep.mubr.msk.bf16.mxu1 %vm2749_vm5, %v2748_v59 }
 0x1b4   :  { %2345 = vmatpush3.bf16.msra.mxu0 %v2633_v8  ;;  %2420 = vmatprep.subr.bf16.mxu1 %v2748_v59  ;;  %v3159_v8 = vand.u32 127, %v33_v60  ;;  %v2654_v60 = vld [vmem:[%s3383_s1 + $0x170] sm:$0xff]  }
 0x1b5   :  { %2346 = vmatprep.subr.bf16.mxu0 %v2634_v9 }
 0x1b6   :  { %vm1194_vm8 = vcmp.eq.s32.totalorder %v1163_v11, %v3159_v8 }
 0x1b7   :  { %2421 = vmatpush3.bf16.msra.mxu1 %v2635_v10  ;;  %v2273_v15 = vsel %vm1194_vm8, 1.0, %v2748_v59 }
 0x1b8   :  { %2347 = vmatpush3.bf16.msra.mxu0 %v2636_v12  ;;  %2422 = vmatprep.subr.bf16.mxu1 %v2748_v59 }
 0x1b9   :  { %2348 = vmatprep.subr.bf16.mxu0 %v2637_v13  ;;  %v1282_v13 = vsel %vm82_vm0, %v2652_v34, 0 }
 0x1bb   :  { %2423 = vmatpush3.bf16.msra.mxu1 %v2638_v14  ;;  %v2653_v14 = vld [vmem:[%s3383_s1 + $0x178] sm:$0xff]  }
 0x1bc   :  { %2349 = vmatpush3.bf16.msra.mxu0 %v2639_v16  ;;  %2428 = vmatprep.subr.bf16.mxu1 %v2748_v59  ;;  %v1166_v16 = vpop.permute.xlu1 %1165 }
 0x1bd   :  { %2350 = vmatprep.subr.bf16.mxu0 %v2640_v17  ;;  %vm1195_vm9 = vcmp.eq.s32.totalorder %v1166_v16, %v3159_v8 }
 0x1be   :  { %2425 = vmatmul.mubr.msk.bf16.vlgmr.msra.gmra.mxu1 %vm704_vm6, %v515_v19  ;;  %v2274_v17 = vsel %vm1195_vm9, 1.0, %v2748_v59  ;;  %v1172_v19 = vpop.permute.xlu0 %1171 }
 0x1bf   :  { %2436 = vmatprep.mubr.msk.bf16.mxu1 %vm2749_vm5, %v2748_v59  ;;  %2429 = vmatpush3.bf16.msra.mxu1 %v2648_v30  ;;  %vm1197_vm12 = vcmp.eq.s32.totalorder %v1172_v19, %v3159_v8 }
 0x1c0   :  { %2351 = vmatpush3.bf16.msra.mxu0 %v2641_v20  ;;  %2430 = vmatprep.subr.bf16.mxu1 %v2748_v59  ;;  %v1227_v20 = vpack.c.bf16 %v2274_v17, %v2273_v15 }
 0x1c1   :  { %2352 = vmatprep.subr.bf16.mxu0 %v2642_v21  ;;  %v1169_v21 = vpop.permute.xlu1 %1168 }
 0x1c2   :  { %vm1196_vm11 = vcmp.eq.s32.totalorder %v1169_v21, %v3159_v8 }
 0x1c3   :  { %2431 = vmatpush3.bf16.msra.mxu1 %v2649_v31 }
 0x1c4   :  { %2353 = vmatpush3.bf16.msra.mxu0 %v2643_v22  ;;  %2432 = vmatprep.subr.bf16.mxu1 %v2748_v59  ;;  %v2655_v22 = vld [vmem:[%s3383_s1 + $0x168] sm:$0xff]  }
 0x1c5   :  { %2354 = vmatprep.subr.bf16.mxu0 %v2644_v23  ;;  %v2275_v23 = vsel %vm1196_vm11, 1.0, %v2748_v59 }
 0x1c7   :  { %2433 = vmatpush3.bf16.msra.mxu1 %v2650_v32 }
 0x1c8   :  { %2355 = vmatpush3.bf16.msra.mxu0 %v2645_v24  ;;  %2434 = vmatprep.subr.bf16.mxu1 %v2748_v59  ;;  %v2276_v24 = vsel %vm1197_vm12, 1.0, %v2748_v59 }
 0x1c9   :  { %2356 = vmatprep.subr.bf16.mxu0 %v2646_v26  ;;  %v1228_v25 = vpack.c.bf16 %v2276_v24, %v2275_v23  ;;  %v2657_v26 = vld [vmem:[%s3383_s1 + $0x158] sm:$0xff]  }
 0x1cb   :  { %2435 = vmatpush3.bf16.msra.mxu1 %v2651_v33 }
 0x1cc   :  { %2357 = vmatpush3.bf16.msra.mxu0 %v2647_v27  ;;  %2534 = vmatprep.subr.msk.bf16.mxu1 %vm82_vm0, %v2652_v34  ;;  %v3189_v27 = vld [vmem:[%s3383_s1 + $0x130] sm:$0xff]  }
 0x1cd   :  { %2440 = vmatprep.subr.bf16.mxu0 %v2748_v59 }
 0x1cf   :  { %942 = vmatmul.mubr.bf16.vlgmr.msra.gmra.mxu0 %v513_v29 }
 0x1d0   :  { %2444 = vmatprep.mubr.msk.bf16.mxu0 %vm2749_vm5, %v2748_v59  ;;  %2441 = vmatpush3.bf16.msra.mxu0 %v2656_v39 }
 0x1d1   :  { %2442 = vmatprep.subr.bf16.mxu0 %v2748_v59 }
 0x1d4   :  { %2443 = vmatpush3.bf16.msra.mxu0 %v2657_v26 }
 0x1d5   :  { %2468 = vmatprep.subr.bf16.mxu0 %v2748_v59 }
 0x26f   :  { %v786_v40 = vpop.f32.mrf.mxu0 }
 0x271   :  { %v2416_v41 = vpop.f32.mrf.mxu0 }
 0x272   :  { %v2332_v42 = vpop.f32.mrf.mxu1 }
 0x273   :  { %v789_v43 = vpop.f32.mrf.mxu0 }
 0x274   :  { %v2333_v44 = vpop.f32.mrf.mxu1 }
 0x275   :  { %v2417_v45 = vpop.f32.mrf.mxu0  ;;  %v2334_v52 = vadd.f32 %v2333_v44, %v2332_v42 }
 0x276   :  { %v2335_v46 = vpop.f32.mrf.mxu1 }
 0x277   :  { %v787_v55 = vadd.f32 %v2334_v52, %v786_v40 }
 0x278   :  { %v2336_v47 = vpop.f32.mrf.mxu1 }
 0x27e   :  { %v983_v48 = vpop.f32.mrf.mxu1 }
 0x280   :  { %v2426_v18 = vpop.f32.mrf.mxu1 }
 0x282   :  { %v986_v49 = vpop.f32.mrf.mxu1 }
 0x284   :  { %v2427_v50 = vpop.f32.mrf.mxu1 }
 0x28f   :  { %v2358_v53 = vpop.f32.mrf.mxu0 }
 0x291   :  { %v2359_v54 = vpop.f32.mrf.mxu0 }
 0x292   :  { %v2360_v56 = vadd.f32 %v2359_v54, %v2358_v53 }
 0x293   :  { %v2361_v58 = vpop.f32.mrf.mxu0 }
 0x294   :  { %v944_v61 = vadd.f32 %v2360_v56, %v787_v55 }
 0x295   :  { %v2362_v63 = vpop.f32.mrf.mxu0 }
 0x296   :  { %v984_v2 = vadd.f32 %v983_v48, %v944_v61 }
 0x298   :  { %v996_v5 = vadd.f32 %v995_v3, %v984_v2 }
 0x29a   :  { %v1003_v7 = vadd.f32 %v1002_v4, %v996_v5 }
 0x29c   :  { %v1005_v9 = vadd.f32 %v1004_v6, %v1003_v7 }
 0x29e   :  { %v1006_v10 = vmax.f32 %v1005_v9, 0.0 }
 0x2a0   :  { %v1007_v12 = vpack.c.bf16 %v1006_v10, %v1006_v10 }
 0x2a2   :  { %2437 = vmatmul.mubr.msk.bf16.vlgmr.msra.gmra.mxu1 %vm1041_vm7, %v1007_v12 }
 0x2a3   :  { %2449 = vmatpush3.bf16.msra.mxu1 %v1282_v13  ;;  %2456 = vmatprep.mubr.msk.bf16.mxu1 %vm1262_vm10, %v1227_v20 }
 0x2a4   :  { %2450 = vmatprep.subr.bf16.mxu1 %v2653_v14 }
 0x2a7   :  { %2451 = vmatpush3.bf16.msra.mxu1 %v2653_v14 }
 0x2a8   :  { %2452 = vmatprep.subr.bf16.mxu1 %v2654_v60 }
 0x2ab   :  { %2453 = vmatpush3.bf16.msra.mxu1 %v2654_v60 }
 0x2ac   :  { %2454 = vmatprep.subr.bf16.mxu1 %v2655_v22 }
 0x2af   :  { %2455 = vmatpush3.bf16.msra.mxu1 %v2655_v22 }
 0x2b0   :  { %2492 = vmatprep.subr.bf16.mxu1 %v2748_v59 }
 0x2b2   :  { %2457 = vmatmul.mubr.msk.bf16.vlgmr.msra.gmra.mxu1 %vm1262_vm10, %v1228_v25 }
 0x2b3   :  { %2493 = vmatpush3.bf16.msra.mxu1 %v3189_v27 }
 0x2b4   :  { %2504 = vmatprep.subr.bf16.mxu1 %v2748_v59 }
 0x362   :  { %v1079_v29 = vpop.f32.mrf.mxu1 }
 0x363   :  { %v1080_v30 = vadd.f32 %v1079_v29, %v1016_v28 }
 0x364   :  { %v2438_v31 = vpop.f32.mrf.mxu1 }
 0x365   :  { %v1085_v32 = vmax.f32 %v1080_v30, 0.0 }
 0x366   :  { %v1082_v33 = vpop.f32.mrf.mxu1 }
 0x367   :  { %v1086_v34 = vpack.c.bf16 %v1085_v32, %v1085_v32 }
 0x368   :  { %v2439_v35 = vpop.f32.mrf.mxu1 }
 0x369   :  { %2445 = vmatmul.mubr.msk.bf16.vlgmr.msra.gmra.mxu0 %vm1104_vm13, %v1086_v34 }
 0x36a   :  { %2469 = vmatpush3.bf16.msra.mxu0 %v3189_v27  ;;  %2470 = vmatprep.mubr.msk.bf16.mxu0 %vm2749_vm5, %v2748_v59 }
 0x36b   :  { %2474 = vmatprep.subr.bf16.mxu0 %v2748_v59 }
 0x371   :  { %2471 = vmatmul.mubr.bf16.vlgmr.msra.gmra.mxu0 %v2747_v1  ;;  %v3217_v1 = vld [vmem:[%s3384_s2 + $0x7] ss:$0 sm:$0xff]  ;;  %s2753_s2 = smov 16  }
 0x372   :  { %2475 = vmatpush3.bf16.msra.mxu0 %v3189_v27  ;;  %2476 = vmatprep.mubr.msk.bf16.mxu0 %vm2749_vm5, %v2748_v59  ;;  %v3208_v39 = vpop.f32.mrf.mxu1 }
 0x373   :  { %2480 = vmatprep.subr.bf16.mxu0 %v2748_v59  ;;  %v1327_v28 = vadd.f32 %v3208_v39, %v3217_v1 }
 0x374   :  { %v1318_v42 = vpop.f32.mrf.mxu1 }
 0x375   :  { %v1319_v44 = vadd.f32 %v1318_v42, %v3217_v1 }
 0x376   :  { %v3229_v3 = vpop.f32.mrf.mxu1 }
 0x378   :  { %v1321_v4 = vpop.f32.mrf.mxu1 }
 0x379   :  { %v1322_v5 = vadd.f32 %v1321_v4, %v3217_v1 }
 0x429   :  { %v1142_v37 = vpop.f32.mrf.mxu0 }
 0x42a   :  { %v1143_v38 = vadd.f32 %v1142_v37, %v1091_v36 }
 0x42b   :  { %v2446_v40 = vpop.f32.mrf.mxu0 }
 0x42c   :  { %2162 = vst.msk [vmem:[%s3386_s5] sm:$0xff] %vm1372_vm14, %v1143_v38 }
 0x42d   :  { %v1145_v41 = vpop.f32.mrf.mxu0 }
 0x42f   :  { %v2447_v43 = vpop.f32.mrf.mxu0 }
 0x431   :  { %v1410_v45 = vpop.f32.mrf.mxu0 }
 0x432   :  { %v1416_v46 = vadd.f32 %v1410_v45, %v1319_v44 }
 0x433   :  { %v2472_v47 = vpop.f32.mrf.mxu0 }
 0x434   :  { %2659 = vtanh.f32 %v1416_v46  ;;  %v2295_v50 = vmul.f32 -1.442695, %v1416_v46 }
 0x435   :  { %v1413_v48 = vpop.f32.mrf.mxu0 }
 0x436   :  { %2661 = vpow2.f32 %v2295_v50 }
 0x437   :  { %v2473_v18 = vpop.f32.mrf.mxu0 }
 0x438   :  { %v1330_v18 = vadd.f32 %v3229_v3, %v3217_v1  ;;  %v1158_v3 = vld [vmem:[%s3385_s4 + $0x50] sm:$0xff] }
 0x441   :  { %v2660_v49 = vpop.eup %2659 }
 0x442   :  { %1426 = vrot.lane.b32.xlu1 %v2660_v49, %s2752_s23 }
 0x443   :  { %v2662_v51 = vpop.eup %2661 }
 0x444   :  { %v1420_v52 = vadd.f32 1.0, %v2662_v51 }
 0x446   :  { %2663 = vrcp.f32 %v1420_v52 }
 0x453   :  { %v2664_v53 = vpop.eup %2663 }
 0x454   :  { %v1424_v56 = vmul.f32 0.0, %v2664_v53 }
 0x4b4   :  { %v1427_v54 = vpop.permute.xlu1 %1426 }
 0x4b5   :  { %v1429_v55 = vmul.f32 %v2664_v53, %v1427_v54 }
 0x4b7   :  { %1431 = vrot.lane.b32.xlu1 %v1429_v55, %s2753_s2 }
 0x529   :  { %v1432_v57 = vpop.permute.xlu1 %1431 }
 0x52a   :  { %v1434_v58 = vadd.f32 %v1432_v57, %v1424_v56 }
 0x52c   :  { %2665 = vtanh.f32 %v1434_v58 }
 0x539   :  { %v2666_v62 = vpop.eup %2665 }
 0x53a   :  { %1437 = vrot.lane.b32.xlu0 %v2666_v62, %s2754_s24 }
 0x5ac   :  { %v1438_v0 = vpop.permute.xlu0 %1437 }
 0x5ad   :  { %v1440_v61 = vmul.f32 %v2664_v53, %v1438_v0 }
 0x5af   :  { %v1441_v63 = vpack.c.bf16 %v1440_v61, %v1440_v61  ;;  %v1152_v61 = vld [vmem:[%s3385_s4 + $0x20] sm:$0xff] }
 0x5b1   :  { %1443 = vrot.lane.b32.xlu1 %v1441_v63, %s2755_s25  ;;  %v1154_v63 = vld [vmem:[%s3385_s4 + $0x30] sm:$0xff] }
 0x623   :  { %v1444_v2 = vpop.permute.xlu1 %1443 }
 0x624   :  { %2477 = vmatmul.mubr.msk.bf16.vlgmr.msra.gmra.mxu0 %vm1372_vm14, %v1444_v2  ;;  %v1156_v2 = vld [vmem:[%s3385_s4 + $0x40] sm:$0xff] }
 0x625   :  { %2481 = vmatpush3.bf16.msra.mxu0 %v3189_v27  ;;  %2482 = vmatprep.mubr.msk.bf16.mxu0 %vm2749_vm5, %v2748_v59 }
 0x626   :  { %2486 = vmatprep.subr.bf16.mxu0 %v2748_v59 }
 0x6e4   :  { %v1482_v6 = vpop.f32.mrf.mxu0 }
 0x6e5   :  { %v1488_v7 = vadd.f32 %v1482_v6, %v1322_v5 }
 0x6e6   :  { %v2478_v9 = vpop.f32.mrf.mxu0 }
 0x6e7   :  { %2667 = vtanh.f32 %v1488_v7  ;;  %v2297_v13 = vmul.f32 -1.442695, %v1488_v7  ;;  %v1153_v9 = vld [vmem:[%s3385_s4 + $0x28] sm:$0xff] }
 0x6e8   :  { %v1485_v10 = vpop.f32.mrf.mxu0 }
 0x6e9   :  { %2669 = vpow2.f32 %v2297_v13  ;;  %v1155_v10 = vld [vmem:[%s3385_s4 + $0x38] sm:$0xff] }
 0x6ea   :  { %v2479_v11 = vpop.f32.mrf.mxu0 }
 0x6eb   :  { %v1157_v11 = vld [vmem:[%s3385_s4 + $0x48] sm:$0xff] }
 0x6f4   :  { %v2668_v12 = vpop.eup %2667 }
 0x6f5   :  { %1498 = vrot.lane.b32.xlu0 %v2668_v12, %s2752_s23 }
 0x6f6   :  { %v2670_v14 = vpop.eup %2669 }
 0x6f7   :  { %v1492_v15 = vadd.f32 1.0, %v2670_v14 }
 0x6f9   :  { %2671 = vrcp.f32 %v1492_v15 }
 0x706   :  { %v2672_v16 = vpop.eup %2671 }
 0x707   :  { %v1496_v19 = vmul.f32 %v2672_v16, %v1434_v58 }
 0x767   :  { %v1499_v60 = vpop.permute.xlu0 %1498 }
 0x768   :  { %v1501_v17 = vmul.f32 %v2672_v16, %v1499_v60 }
 0x76a   :  { %1503 = vrot.lane.b32.xlu1 %v1501_v17, %s2753_s2 }
 0x7dc   :  { %v1504_v20 = vpop.permute.xlu1 %1503 }
 0x7dd   :  { %v1506_v21 = vadd.f32 %v1504_v20, %v1496_v19 }
 0x7df   :  { %2673 = vtanh.f32 %v1506_v21 }
 0x7ec   :  { %v2674_v22 = vpop.eup %2673 }
 0x7ed   :  { %1509 = vrot.lane.b32.xlu0 %v2674_v22, %s2754_s24 }
 0x85f   :  { %v1510_v23 = vpop.permute.xlu0 %1509 }
 0x860   :  { %v1512_v24 = vmul.f32 %v2672_v16, %v1510_v23 }
 0x862   :  { %v1513_v25 = vpack.c.bf16 %v1512_v24, %v1512_v24 }
 0x864   :  { %1515 = vrot.lane.b32.xlu1 %v1513_v25, %s2755_s25 }
 0x8d6   :  { %v1516_v26 = vpop.permute.xlu1 %1515 }
 0x8d7   :  { %2483 = vmatmul.mubr.msk.bf16.vlgmr.msra.gmra.mxu0 %vm1372_vm14, %v1516_v26 }
 0x8d8   :  { %2487 = vmatpush3.bf16.msra.mxu0 %v3189_v27  ;;  %2488 = vmatprep.mubr.msk.bf16.mxu0 %vm2749_vm5, %v2748_v59 }
 0x8d9   :  { %2498 = vmatprep.subr.bf16.mxu0 %v2748_v59 }
 0x997   :  { %v1554_v29 = vpop.f32.mrf.mxu0 }
 0x998   :  { %v1560_v30 = vadd.f32 %v1554_v29, %v1327_v28 }
 0x999   :  { %v2484_v31 = vpop.f32.mrf.mxu0 }
 0x99a   :  { %2675 = vtanh.f32 %v1560_v30  ;;  %v2299_v35 = vmul.f32 -1.442695, %v1560_v30 }
 0x99b   :  { %v1557_v32 = vpop.f32.mrf.mxu0 }
 0x99c   :  { %2677 = vpow2.f32 %v2299_v35 }
 0x99d   :  { %v2485_v33 = vpop.f32.mrf.mxu0 }
 0x9a7   :  { %v2676_v34 = vpop.eup %2675 }
 0x9a8   :  { %1570 = vrot.lane.b32.xlu0 %v2676_v34, %s2752_s23 }
 0x9a9   :  { %v2678_v36 = vpop.eup %2677 }
 0x9aa   :  { %v1564_v37 = vadd.f32 1.0, %v2678_v36 }
 0x9ac   :  { %2679 = vrcp.f32 %v1564_v37 }
 0x9b9   :  { %v2680_v38 = vpop.eup %2679 }
 0x9ba   :  { %v1568_v39 = vmul.f32 %v2680_v38, %v1506_v21 }
 0xa1a   :  { %v1571_v40 = vpop.permute.xlu0 %1570 }
 0xa1b   :  { %v1573_v41 = vmul.f32 %v2680_v38, %v1571_v40 }
 0xa1d   :  { %1575 = vrot.lane.b32.xlu1 %v1573_v41, %s2753_s2 }
 0xa8f   :  { %v1576_v42 = vpop.permute.xlu1 %1575 }
 0xa90   :  { %v1578_v43 = vadd.f32 %v1576_v42, %v1568_v39 }
 0xa92   :  { %2681 = vtanh.f32 %v1578_v43 }
 0xa9f   :  { %v2682_v44 = vpop.eup %2681 }
 0xaa0   :  { %1581 = vrot.lane.b32.xlu0 %v2682_v44, %s2754_s24 }
 0xb12   :  { %v1582_v45 = vpop.permute.xlu0 %1581 }
 0xb13   :  { %v1584_v46 = vmul.f32 %v2680_v38, %v1582_v45 }
 0xb15   :  { %v1585_v47 = vpack.c.bf16 %v1584_v46, %v1584_v46 }
 0xb17   :  { %1587 = vrot.lane.b32.xlu1 %v1585_v47, %s2755_s25 }
 0xb89   :  { %v1588_v48 = vpop.permute.xlu1 %1587 }
 0xb8a   :  { %2489 = vmatmul.mubr.msk.bf16.vlgmr.msra.gmra.mxu0 %vm1372_vm14, %v1588_v48 }
 0xb8b   :  { %2499 = vmatpush3.bf16.msra.mxu0 %v3189_v27  ;;  %2500 = vmatprep.mubr.msk.bf16.mxu0 %vm2749_vm5, %v2748_v59 }
 0xb8c   :  { %2510 = vmatprep.subr.bf16.mxu0 %v2748_v59 }
 0xc4a   :  { %v1626_v49 = vpop.f32.mrf.mxu0 }
 0xc4b   :  { %v1632_v50 = vadd.f32 %v1626_v49, %v1330_v18 }
 0xc4c   :  { %v2490_v51 = vpop.f32.mrf.mxu0 }
 0xc4d   :  { %2683 = vtanh.f32 %v1632_v50  ;;  %v2301_v55 = vmul.f32 -1.442695, %v1632_v50 }
 0xc4e   :  { %v1629_v52 = vpop.f32.mrf.mxu0 }
 0xc4f   :  { %2685 = vpow2.f32 %v2301_v55 }
 0xc50   :  { %v2491_v53 = vpop.f32.mrf.mxu0 }
 0xc5a   :  { %v2684_v54 = vpop.eup %2683 }
 0xc5b   :  { %1642 = vrot.lane.b32.xlu0 %v2684_v54, %s2752_s23 }
 0xc5c   :  { %v2686_v56 = vpop.eup %2685 }
 0xc5d   :  { %v1636_v57 = vadd.f32 1.0, %v2686_v56 }
 0xc5f   :  { %2687 = vrcp.f32 %v1636_v57 }
 0xc6c   :  { %v2688_v58 = vpop.eup %2687 }
 0xc6d   :  { %v1640_v4 = vmul.f32 %v2688_v58, %v1578_v43 }
 0xccd   :  { %v1643_v62 = vpop.permute.xlu0 %1642 }
 0xcce   :  { %v1645_v0 = vmul.f32 %v2688_v58, %v1643_v62 }
 0xcd0   :  { %1647 = vrot.lane.b32.xlu1 %v1645_v0, %s2753_s2 }
 0xcd4   :  { %1174 = vperm.xlu1 %2546, %v1152_v61  }
 0xcd8   :  { %1180 = vperm.xlu1 %2546, %v1154_v63  }
 0xcdc   :  { %1186 = vperm.xlu1 %2546, %v1156_v2  }
 0xce0   :  { %1192 = vperm.xlu1 %2546, %v1158_v3  }
 0xd42   :  { %v1648_v5 = vpop.permute.xlu1 %1647 }
 0xd43   :  { %v3268_v6 = vadd.f32 %v1648_v5, %v1640_v4 }
 0xd45   :  { %2689 = vtanh.f32 %v3268_v6 }
 0xd4f   :  { %v1175_v13 = vpop.permute.xlu1 %1174 }
 0xd50   :  { %vm1198_vm15 = vcmp.eq.s32.totalorder %v1175_v13, %v3159_v8 }
 0xd51   :  { %v2277_v19 = vsel %vm1198_vm15, 1.0, %v2748_v59 }
 0xd52   :  { %v2690_v7 = vpop.eup %2689 }
 0xd53   :  { %1653 = vrot.lane.b32.xlu0 %v2690_v7, %s2754_s24  ;;  %v1181_v16 = vpop.permute.xlu1 %1180 }
 0xd54   :  { %vm1200_vm1 = vcmp.eq.s32.totalorder %v1181_v16, %v3159_v8 }
 0xd55   :  { %v2279_v23 = vsel %vm1200_vm1, 1.0, %v2748_v59 }
 0xd57   :  { %1177 = vperm.xlu0 %2547, %v1153_v9   ;;  %v1187_v60 = vpop.permute.xlu1 %1186 }
 0xd58   :  { %vm1202_vm3 = vcmp.eq.s32.totalorder %v1187_v60, %v3159_v8 }
 0xd59   :  { %v2281_v29 = vsel %vm1202_vm3, 1.0, %v2748_v59 }
 0xd5b   :  { %1183 = vperm.xlu0 %2547, %v1155_v10   ;;  %v1193_v24 = vpop.permute.xlu1 %1192 }
 0xd5c   :  { %vm1204_vm4 = vcmp.eq.s32.totalorder %v1193_v24, %v3159_v8 }
 0xd5d   :  { %v2283_v32 = vsel %vm1204_vm4, 1.0, %v2748_v59 }
 0xd5e   :  { %v1232_v33 = vpack.c.bf16 %v2283_v32, %v2283_v32 }
 0xd5f   :  { %1189 = vperm.xlu0 %2547, %v1157_v11  }
 0xdc5   :  { %v1654_v12 = vpop.permute.xlu0 %1653 }
 0xdc6   :  { %v1656_v14 = vmul.f32 %v2688_v58, %v1654_v12 }
 0xdc8   :  { %v1657_v15 = vpack.c.bf16 %v1656_v14, %v1656_v14 }
 0xdca   :  { %1659 = vrot.lane.b32.xlu0 %v1657_v15, %s2755_s25 }
 0xdd2   :  { %v1178_v17 = vpop.permute.xlu0 %1177 }
 0xdd3   :  { %vm1199_vm0 = vcmp.eq.s32.totalorder %v1178_v17, %v3159_v8 }
 0xdd4   :  { %v2278_v20 = vsel %vm1199_vm0, 1.0, %v2748_v59 }
 0xdd5   :  { %v1229_v21 = vpack.c.bf16 %v2278_v20, %v2277_v19 }
 0xdd6   :  { %v1184_v22 = vpop.permute.xlu0 %1183 }
 0xdd7   :  { %vm1201_vm2 = vcmp.eq.s32.totalorder %v1184_v22, %v3159_v8  ;;  %2460 = vmatprep.mubr.msk.bf16.mxu1 %vm1262_vm10, %v1229_v21 }
 0xdd8   :  { %v2280_v25 = vsel %vm1201_vm2, 1.0, %v2748_v59 }
 0xdd9   :  { %v1230_v26 = vpack.c.bf16 %v2280_v25, %v2279_v23 }
 0xdda   :  { %v1190_v28 = vpop.permute.xlu0 %1189 }
 0xddb   :  { %vm1203_vm6 = vcmp.eq.s32.totalorder %v1190_v28, %v3159_v8  ;;  %2461 = vmatmul.mubr.msk.bf16.gmra.mxu1 %vm1262_vm10, %v1230_v26 }
 0xddc   :  { %v2282_v30 = vsel %vm1203_vm6, 1.0, %v2748_v59 }
 0xddd   :  { %v1231_v31 = vpack.c.bf16 %v2282_v30, %v2281_v29 }
 0xddf   :  { %2464 = vmatprep.mubr.msk.bf16.mxu1 %vm1262_vm10, %v1231_v31 }
 0xde3   :  { %2465 = vmatmul.mubr.msk.bf16.gmra.mxu1 %vm1262_vm10, %v1232_v33 }
 0xde4   :  { %2494 = vmatprep.mubr.msk.bf16.mxu1 %vm2749_vm5, %v2748_v59 }
 0xe3c   :  { %v1660_v34 = vpop.permute.xlu0 %1659 }
 0xe3d   :  { %2495 = vmatmul.mubr.msk.bf16.vlgmr.msra.gmra.mxu1 %vm1372_vm14, %v1660_v34 }
 0xe3e   :  { %2505 = vmatpush3.bf16.msra.mxu1 %v3189_v27  ;;  %2506 = vmatprep.mubr.msk.bf16.mxu1 %vm2749_vm5, %v2748_v59 }
 0xe3f   :  { %2516 = vmatprep.subr.bf16.mxu1 %v2748_v59 }
 0xe9b   :  { %v3307_v8 = vpop.f32.mrf.mxu1 }
 0xe9c   :  { %v1343_v23 = vadd.f32 %v3307_v8, %v3217_v1 }
 0xe9d   :  { %v1334_v35 = vpop.f32.mrf.mxu1 }
 0xe9e   :  { %v1335_v42 = vadd.f32 %v1334_v35, %v3217_v1 }
 0xe9f   :  { %v3309_v36 = vpop.f32.mrf.mxu1 }
 0xea1   :  { %v1337_v37 = vpop.f32.mrf.mxu1 }
 0xea2   :  { %v1338_v63 = vadd.f32 %v1337_v37, %v3217_v1 }
 0xea3   :  { %v3311_v38 = vpop.f32.mrf.mxu1 }
 0xea5   :  { %v3313_v40 = vpop.f32.mrf.mxu1 }
 0xea7   :  { %v2467_v41 = vpop.f32.mrf.mxu1 }
 0xea9   :  { %v3315_v39 = vpop.f32.mrf.mxu1 }
 0xefd   :  { %v1698_v43 = vpop.f32.mrf.mxu1 }
 0xefe   :  { %v1704_v44 = vadd.f32 %v1698_v43, %v1335_v42 }
 0xeff   :  { %v2496_v45 = vpop.f32.mrf.mxu1 }
 0xf00   :  { %2691 = vtanh.f32 %v1704_v44  ;;  %v2303_v18 = vmul.f32 -1.442695, %v1704_v44 }
 0xf01   :  { %v1701_v46 = vpop.f32.mrf.mxu1 }
 0xf02   :  { %2693 = vpow2.f32 %v2303_v18 }
 0xf03   :  { %v2497_v47 = vpop.f32.mrf.mxu1 }
 0xf0d   :  { %v2692_v48 = vpop.eup %2691 }
 0xf0e   :  { %1714 = vrot.lane.b32.xlu1 %v2692_v48, %s2752_s23  ;;  %v1346_v48 = vadd.f32 %v3309_v36, %v3217_v1 }
 0xf0f   :  { %v2694_v49 = vpop.eup %2693 }
 0xf10   :  { %v1708_v50 = vadd.f32 1.0, %v2694_v49 }
 0xf12   :  { %2695 = vrcp.f32 %v1708_v50 }
 0xf1f   :  { %v2696_v51 = vpop.eup %2695 }
 0xf20   :  { %v1712_v54 = vmul.f32 %v2696_v51, %v3268_v6 }
 0xf80   :  { %v1715_v52 = vpop.permute.xlu1 %1714 }
 0xf81   :  { %v1717_v53 = vmul.f32 %v2696_v51, %v1715_v52 }
 0xf83   :  { %1719 = vrot.lane.b32.xlu0 %v1717_v53, %s2753_s2 }
 0xff5   :  { %v1720_v55 = vpop.permute.xlu0 %1719 }
 0xff6   :  { %v1722_v56 = vadd.f32 %v1720_v55, %v1712_v54 }
 0xff8   :  { %2697 = vtanh.f32 %v1722_v56 }
0x1005   :  { %v2698_v57 = vpop.eup %2697 }
0x1006   :  { %1725 = vrot.lane.b32.xlu1 %v2698_v57, %s2754_s24 }
0x1078   :  { %v1726_v58 = vpop.permute.xlu1 %1725 }
0x1079   :  { %v1728_v62 = vmul.f32 %v2696_v51, %v1726_v58 }
0x107b   :  { %v1729_v0 = vpack.c.bf16 %v1728_v62, %v1728_v62 }
0x107d   :  { %1731 = vrot.lane.b32.xlu0 %v1729_v0, %s2755_s25 }
0x10ef   :  { %v1732_v61 = vpop.permute.xlu0 %1731 }
0x10f0   :  { %2501 = vmatmul.mubr.msk.bf16.vlgmr.msra.gmra.mxu0 %vm1372_vm14, %v1732_v61 }
0x10f1   :  { %2511 = vmatpush3.bf16.msra.mxu0 %v3189_v27  ;;  %2512 = vmatprep.mubr.msk.bf16.mxu0 %vm2749_vm5, %v2748_v59 }
0x10f2   :  { %2522 = vmatprep.subr.bf16.mxu0 %v2748_v59 }
0x11b0   :  { %v1770_v2 = vpop.f32.mrf.mxu0 }
0x11b1   :  { %v1776_v3 = vadd.f32 %v1770_v2, %v1338_v63 }
0x11b2   :  { %v2502_v4 = vpop.f32.mrf.mxu0 }
0x11b3   :  { %2699 = vtanh.f32 %v1776_v3  ;;  %v2305_v9 = vmul.f32 -1.442695, %v1776_v3 }
0x11b4   :  { %v1773_v5 = vpop.f32.mrf.mxu0 }
0x11b5   :  { %2701 = vpow2.f32 %v2305_v9 }
0x11b6   :  { %v2503_v6 = vpop.f32.mrf.mxu0 }
0x11b7   :  { %v1351_v6 = vadd.f32 %v3313_v40, %v3217_v1 }
0x11c0   :  { %v2700_v7 = vpop.eup %2699 }
0x11c1   :  { %1786 = vrot.lane.b32.xlu1 %v2700_v7, %s2752_s23 }
0x11c2   :  { %v2702_v10 = vpop.eup %2701 }
0x11c3   :  { %v1780_v11 = vadd.f32 1.0, %v2702_v10 }
0x11c5   :  { %2703 = vrcp.f32 %v1780_v11 }
0x11d2   :  { %v2704_v12 = vpop.eup %2703 }
0x11d3   :  { %v1784_v15 = vmul.f32 %v2704_v12, %v1722_v56 }
0x1233   :  { %v1787_v13 = vpop.permute.xlu1 %1786 }
0x1234   :  { %v1789_v14 = vmul.f32 %v2704_v12, %v1787_v13 }
0x1236   :  { %1791 = vrot.lane.b32.xlu0 %v1789_v14, %s2753_s2 }
0x12a8   :  { %v1792_v16 = vpop.permute.xlu0 %1791 }
0x12a9   :  { %v1794_v60 = vadd.f32 %v1792_v16, %v1784_v15 }
0x12ab   :  { %2705 = vtanh.f32 %v1794_v60 }
0x12b8   :  { %v2706_v17 = vpop.eup %2705 }
0x12b9   :  { %1797 = vrot.lane.b32.xlu1 %v2706_v17, %s2754_s24 }
0x132b   :  { %v1798_v19 = vpop.permute.xlu1 %1797 }
0x132c   :  { %v1800_v20 = vmul.f32 %v2704_v12, %v1798_v19 }
0x132e   :  { %v1801_v21 = vpack.c.bf16 %v1800_v20, %v1800_v20 }
0x1330   :  { %1803 = vrot.lane.b32.xlu0 %v1801_v21, %s2755_s25 }
0x13a2   :  { %v1804_v22 = vpop.permute.xlu0 %1803 }
0x13a3   :  { %2507 = vmatmul.mubr.msk.bf16.vlgmr.msra.gmra.mxu1 %vm1372_vm14, %v1804_v22 }
0x13a4   :  { %2517 = vmatpush3.bf16.msra.mxu1 %v3189_v27  ;;  %2518 = vmatprep.mubr.msk.bf16.mxu1 %vm2749_vm5, %v2748_v59 }
0x13a5   :  { %2528 = vmatprep.subr.bf16.mxu1 %v2748_v59 }
0x1463   :  { %v1842_v24 = vpop.f32.mrf.mxu1 }
0x1464   :  { %v1848_v25 = vadd.f32 %v1842_v24, %v1343_v23 }
0x1465   :  { %v2508_v26 = vpop.f32.mrf.mxu1 }
0x1466   :  { %2707 = vtanh.f32 %v1848_v25  ;;  %v2307_v31 = vmul.f32 -1.442695, %v1848_v25  ;;  %v1354_v25 = vadd.f32 %v3315_v39, %v3217_v1 }
0x1467   :  { %v1845_v28 = vpop.f32.mrf.mxu1 }
0x1468   :  { %2709 = vpow2.f32 %v2307_v31 }
0x1469   :  { %v2509_v29 = vpop.f32.mrf.mxu1 }
0x1473   :  { %v2708_v30 = vpop.eup %2707 }
0x1474   :  { %1858 = vrot.lane.b32.xlu1 %v2708_v30, %s2752_s23 }
0x1475   :  { %v2710_v32 = vpop.eup %2709 }
0x1476   :  { %v1852_v33 = vadd.f32 1.0, %v2710_v32 }
0x1478   :  { %2711 = vrcp.f32 %v1852_v33 }
0x1485   :  { %v2712_v34 = vpop.eup %2711 }
0x1486   :  { %v1856_v8 = vmul.f32 %v2712_v34, %v1794_v60 }
0x14e6   :  { %v1859_v35 = vpop.permute.xlu1 %1858 }
0x14e7   :  { %v1861_v37 = vmul.f32 %v2712_v34, %v1859_v35 }
0x14e9   :  { %1863 = vrot.lane.b32.xlu0 %v1861_v37, %s2753_s2 }
0x155b   :  { %v1864_v41 = vpop.permute.xlu0 %1863 }
0x155c   :  { %v1866_v42 = vadd.f32 %v1864_v41, %v1856_v8 }
0x155e   :  { %2713 = vtanh.f32 %v1866_v42 }
0x156b   :  { %v2714_v43 = vpop.eup %2713 }
0x156c   :  { %1869 = vrot.lane.b32.xlu1 %v2714_v43, %s2754_s24 }
0x15de   :  { %v1870_v44 = vpop.permute.xlu1 %1869 }
0x15df   :  { %v1872_v45 = vmul.f32 %v2712_v34, %v1870_v44 }
0x15e1   :  { %v1873_v46 = vpack.c.bf16 %v1872_v45, %v1872_v45 }
0x15e3   :  { %1875 = vrot.lane.b32.xlu0 %v1873_v46, %s2755_s25 }
0x1655   :  { %v1876_v47 = vpop.permute.xlu0 %1875 }
0x1656   :  { %2513 = vmatmul.mubr.msk.bf16.vlgmr.msra.gmra.mxu0 %vm1372_vm14, %v1876_v47 }
0x1657   :  { %2523 = vmatpush3.bf16.msra.mxu0 %v3189_v27  ;;  %2524 = vmatprep.mubr.msk.bf16.mxu0 %vm2749_vm5, %v2748_v59 }
0x1716   :  { %v1914_v18 = vpop.f32.mrf.mxu0 }
0x1717   :  { %v1920_v49 = vadd.f32 %v1914_v18, %v1346_v48  ;;  %v1359_v18 = vadd.f32 %v3311_v38, %v3217_v1 }
0x1718   :  { %v2514_v50 = vpop.f32.mrf.mxu0 }
0x1719   :  { %2715 = vtanh.f32 %v1920_v49  ;;  %v2309_v54 = vmul.f32 -1.442695, %v1920_v49 }
0x171a   :  { %v1917_v51 = vpop.f32.mrf.mxu0 }
0x171b   :  { %2717 = vpow2.f32 %v2309_v54 }
0x171c   :  { %v2515_v52 = vpop.f32.mrf.mxu0 }
0x1726   :  { %v2716_v53 = vpop.eup %2715 }
0x1727   :  { %1930 = vrot.lane.b32.xlu1 %v2716_v53, %s2752_s23 }
0x1728   :  { %v2718_v55 = vpop.eup %2717 }
0x1729   :  { %v1924_v56 = vadd.f32 1.0, %v2718_v55 }
0x172b   :  { %2719 = vrcp.f32 %v1924_v56 }
0x1738   :  { %v2720_v57 = vpop.eup %2719 }
0x1739   :  { %v1928_v36 = vmul.f32 %v2720_v57, %v1866_v42 }
0x1799   :  { %v1931_v58 = vpop.permute.xlu1 %1930 }
0x179a   :  { %v1933_v62 = vmul.f32 %v2720_v57, %v1931_v58 }
0x179c   :  { %1935 = vrot.lane.b32.xlu0 %v1933_v62, %s2753_s2 }
0x180e   :  { %v1936_v0 = vpop.permute.xlu0 %1935 }
0x180f   :  { %v1938_v61 = vadd.f32 %v1936_v0, %v1928_v36 }
0x1811   :  { %2721 = vtanh.f32 %v1938_v61 }
0x181e   :  { %v2722_v63 = vpop.eup %2721 }
0x181f   :  { %1941 = vrot.lane.b32.xlu1 %v2722_v63, %s2754_s24 }
0x1891   :  { %v1942_v2 = vpop.permute.xlu1 %1941 }
0x1892   :  { %v1944_v3 = vmul.f32 %v2720_v57, %v1942_v2 }
0x1894   :  { %v1945_v4 = vpack.c.bf16 %v1944_v3, %v1944_v3 }
0x1896   :  { %1947 = vrot.lane.b32.xlu0 %v1945_v4, %s2755_s25 }
0x1908   :  { %v1948_v5 = vpop.permute.xlu0 %1947 }
0x1909   :  { %2519 = vmatmul.mubr.msk.bf16.vlgmr.msra.gmra.mxu1 %vm1372_vm14, %v1948_v5 }
0x190a   :  { %2529 = vmatpush3.bf16.msra.mxu1 %v3189_v27  ;;  %2530 = vmatprep.mubr.msk.bf16.mxu1 %vm2749_vm5, %v2748_v59  ;;  %vm2167_vm5 = vcmask 261248  }
0x19c9   :  { %v1986_v7 = vpop.f32.mrf.mxu1 }
0x19ca   :  { %v1992_v9 = vadd.f32 %v1986_v7, %v1351_v6 }
0x19cb   :  { %v2520_v10 = vpop.f32.mrf.mxu1 }
0x19cc   :  { %2723 = vtanh.f32 %v1992_v9  ;;  %v2311_v14 = vmul.f32 -1.442695, %v1992_v9 }
0x19cd   :  { %v1989_v11 = vpop.f32.mrf.mxu1 }
0x19ce   :  { %2725 = vpow2.f32 %v2311_v14 }
0x19cf   :  { %v2521_v12 = vpop.f32.mrf.mxu1 }
0x19d9   :  { %v2724_v13 = vpop.eup %2723 }
0x19da   :  { %2002 = vrot.lane.b32.xlu1 %v2724_v13, %s2752_s23 }
0x19db   :  { %v2726_v15 = vpop.eup %2725 }
0x19dc   :  { %v1996_v16 = vadd.f32 1.0, %v2726_v15 }
0x19de   :  { %2727 = vrcp.f32 %v1996_v16 }
0x19eb   :  { %v2728_v27 = vpop.eup %2727 }
0x19ec   :  { %v2000_v40 = vmul.f32 %v2728_v27, %v1938_v61 }
0x1a4c   :  { %v2003_v60 = vpop.permute.xlu1 %2002 }
0x1a4d   :  { %v2005_v59 = vmul.f32 %v2728_v27, %v2003_v60 }
0x1a4f   :  { %2007 = vrot.lane.b32.xlu0 %v2005_v59, %s2753_s2 }
0x1ac1   :  { %v2008_v17 = vpop.permute.xlu0 %2007 }
0x1ac2   :  { %v2010_v19 = vadd.f32 %v2008_v17, %v2000_v40 }
0x1ac4   :  { %2729 = vtanh.f32 %v2010_v19 }
0x1ad1   :  { %v2730_v20 = vpop.eup %2729 }
0x1ad2   :  { %2013 = vrot.lane.b32.xlu1 %v2730_v20, %s2754_s24 }
0x1b44   :  { %v2014_v21 = vpop.permute.xlu1 %2013 }
0x1b45   :  { %v2016_v22 = vmul.f32 %v2728_v27, %v2014_v21 }
0x1b47   :  { %v2017_v23 = vpack.c.bf16 %v2016_v22, %v2016_v22 }
0x1b49   :  { %2019 = vrot.lane.b32.xlu0 %v2017_v23, %s2755_s25 }
0x1bbb   :  { %v2020_v24 = vpop.permute.xlu0 %2019 }
0x1bbc   :  { %2525 = vmatmul.mubr.msk.bf16.vlgmr.msra.gmra.mxu0 %vm1372_vm14, %v2020_v24 }
0x1c7c   :  { %v2058_v26 = vpop.f32.mrf.mxu0 }
0x1c7d   :  { %v2064_v28 = vadd.f32 %v2058_v26, %v1354_v25 }
0x1c7e   :  { %v2526_v29 = vpop.f32.mrf.mxu0 }
0x1c7f   :  { %2731 = vtanh.f32 %v2064_v28  ;;  %v2313_v33 = vmul.f32 -1.442695, %v2064_v28 }
0x1c80   :  { %v2061_v30 = vpop.f32.mrf.mxu0 }
0x1c81   :  { %2733 = vpow2.f32 %v2313_v33 }
0x1c82   :  { %v2527_v31 = vpop.f32.mrf.mxu0 }
0x1c8c   :  { %v2732_v32 = vpop.eup %2731 }
0x1c8d   :  { %2074 = vrot.lane.b32.xlu1 %v2732_v32, %s2752_s23 }
0x1c8e   :  { %v2734_v34 = vpop.eup %2733 }
0x1c8f   :  { %v2068_v35 = vadd.f32 1.0, %v2734_v34 }
0x1c91   :  { %2735 = vrcp.f32 %v2068_v35 }
0x1c9e   :  { %v2736_v37 = vpop.eup %2735 }
0x1c9f   :  { %v2072_v39 = vmul.f32 %v2736_v37, %v2010_v19 }
0x1cff   :  { %v2075_v8 = vpop.permute.xlu1 %2074 }
0x1d00   :  { %v2077_v41 = vmul.f32 %v2736_v37, %v2075_v8 }
0x1d02   :  { %2079 = vrot.lane.b32.xlu0 %v2077_v41, %s2753_s2 }
0x1d74   :  { %v2080_v42 = vpop.permute.xlu0 %2079 }
0x1d75   :  { %v2082_v43 = vadd.f32 %v2080_v42, %v2072_v39 }
0x1d77   :  { %2737 = vtanh.f32 %v2082_v43 }
0x1d84   :  { %v2738_v44 = vpop.eup %2737 }
0x1d85   :  { %2085 = vrot.lane.b32.xlu1 %v2738_v44, %s2754_s24 }
0x1df7   :  { %v2086_v45 = vpop.permute.xlu1 %2085 }
0x1df8   :  { %v2088_v46 = vmul.f32 %v2736_v37, %v2086_v45 }
0x1dfa   :  { %v2089_v47 = vpack.c.bf16 %v2088_v46, %v2088_v46 }
0x1dfc   :  { %2091 = vrot.lane.b32.xlu0 %v2089_v47, %s2755_s25 }
0x1e6e   :  { %v2092_v48 = vpop.permute.xlu0 %2091 }
0x1e6f   :  { %2531 = vmatmul.mubr.msk.bf16.vlgmr.msra.gmra.mxu1 %vm1372_vm14, %v2092_v48 }
0x1f2f   :  { %v2130_v49 = vpop.f32.mrf.mxu1 }
0x1f30   :  { %v2136_v50 = vadd.f32 %v2130_v49, %v1359_v18 }
0x1f31   :  { %v2532_v51 = vpop.f32.mrf.mxu1 }
0x1f32   :  { %2739 = vtanh.f32 %v2136_v50  ;;  %v2315_v55 = vmul.f32 -1.442695, %v2136_v50 }
0x1f33   :  { %v2133_v52 = vpop.f32.mrf.mxu1 }
0x1f34   :  { %2741 = vpow2.f32 %v2315_v55 }
0x1f35   :  { %v2533_v53 = vpop.f32.mrf.mxu1 }
0x1f3f   :  { %v2740_v54 = vpop.eup %2739 }
0x1f40   :  { %2146 = vrot.lane.b32.xlu1 %v2740_v54, %s2752_s23 }
0x1f41   :  { %v2742_v56 = vpop.eup %2741 }
0x1f42   :  { %v2140_v57 = vadd.f32 1.0, %v2742_v56 }
0x1f44   :  { %2743 = vrcp.f32 %v2140_v57 }
0x1f51   :  { %v2744_v58 = vpop.eup %2743 }
0x1f52   :  { %v2144_v1 = vmul.f32 %v2744_v58, %v2082_v43 }
0x1fb2   :  { %v2147_v62 = vpop.permute.xlu1 %2146 }
0x1fb3   :  { %v2149_v36 = vmul.f32 %v2744_v58, %v2147_v62 }
0x1fb5   :  { %2151 = vrot.lane.b32.xlu0 %v2149_v36, %s2753_s2 }
0x2027   :  { %v2152_v38 = vpop.permute.xlu0 %2151 }
0x2028   :  { %v2154_v0 = vadd.f32 %v2152_v38, %v2144_v1 }
0x202a   :  { %2745 = vtanh.f32 %v2154_v0 }
0x2037   :  { %v2746_v61 = vpop.eup %2745 }
0x2038   :  { %2157 = vrot.lane.b32.xlu1 %v2746_v61, %s2754_s24 }
0x20aa   :  { %v2158_v63 = vpop.permute.xlu1 %2157 }
0x20ab   :  { %v2160_v2 = vmul.f32 %v2744_v58, %v2158_v63 }
0x20ad   :  { %v2161_v3 = vmax.f32 %v2160_v2, 0.0 }
0x20af   :  { %2164 = vrot.lane.b32.xlu0 %v2161_v3, %s2752_s23 }
0x2121   :  { %v2165_v4 = vpop.permute.xlu0 %2164 }
0x2122   :  { %2168 = vst.msk [vmem:[%s3386_s5] sm:$0xff] %vm2167_vm5, %v2165_v4 }

</bundles_post_ra>
